<compile_context>
chip_gen: v7x
topology: tpu7x:2x2x1
jax: 0.10.0
libtpu: 0.0.40
codegen_flags: <defaults>
</compile_context>

<pallas_src>
import math

import jax
import jax.numpy as jnp
from jax.experimental import pallas as pl
from jax.experimental.pallas import tpu as pltpu

# ---- model config (small, consistent with the module's forward) -------------
D_MODEL = 32
N_HEAD = 4
D_HEAD = D_MODEL // N_HEAD
D_FF = 64
SEQ = 8
BATCH = 2
NUM_LAYERS = 2
LN_EPS = 1e-5
NEG_MASK = -1e9
# MXU-native operand dtype for every matmul (accumulation stays f32).
# Set to jnp.float32 to recover ~1e-5 parity with the f32 reference.
MATMUL_DTYPE = jnp.bfloat16


# ---- in-kernel helpers -------------------------------------------------------
def _layer_norm(x, gamma, beta):
    mu = jnp.mean(x, axis=-1, keepdims=True)
    var = jnp.mean((x - mu) ** 2, axis=-1, keepdims=True)
    return (x - mu) * jax.lax.rsqrt(var + LN_EPS) * gamma + beta


# ---- fused full-encoder kernel ------------------------------------------------
def _make_encoder_kernel(num_layers, batch, seq, d_model, n_head, has_norm):
    d_head = d_model // n_head
    bs = batch * seq                      # rows of the activation slab

    def kernel(x_ref, mask_ref,
               wqkv_ref, bqkv_ref, wo_ref, bo_ref,
               g1_ref, be1_ref, w1_ref, bf1_ref, w2_ref, bf2_ref,
               g2_ref, be2_ref, *rest):
        if has_norm:
            gn_ref, bn_ref, y_ref, qkv_sc, o_sc = rest
        else:
            y_ref, qkv_sc, o_sc = rest

        x = x_ref[...]                    # (B*S, E) f32, resident in VMEM
        mask = mask_ref[...]              # (H*B*S, H*B*S) block-diagonal additive mask

        for l in range(num_layers):       # static unroll: fused layers
            # ---- QKV projection: ONE (BS,E)@(E,3E) MXU push ------------------
            # (1/sqrt(d_head) already folded into the Q columns of wqkv/bqkv)
            qkv_sc[...] = (jnp.dot(x.astype(MATMUL_DTYPE), wqkv_ref[l],
                                   preferred_element_type=jnp.float32)
                           + bqkv_ref[l])

            # Relayout to head-major rows: (BS, E)-lanes -> (H*BS, Dh).
            # Cheap ref-slice loads + sublane concat; store/XLU slots are idle.
            def head_rows(t):
                return jnp.concatenate(
                    [qkv_sc[:, t * d_model + h * d_head:
                               t * d_model + (h + 1) * d_head]
                     for h in range(n_head)], axis=0).astype(MATMUL_DTYPE)
            q2, k2, v2 = head_rows(0), head_rows(1), head_rows(2)

            # ---- attention: block-diagonal scores, ONE matmul each way -------
            s = jnp.einsum("nd,md->nm", q2, k2,
                           preferred_element_type=jnp.float32) + mask
            m = jnp.max(s, axis=-1, keepdims=True)
            e = jnp.exp(s - m)
            p = e / jnp.sum(e, axis=-1, keepdims=True)        # exact softmax
            o2 = jnp.dot(p.astype(MATMUL_DTYPE), v2,
                         preferred_element_type=jnp.float32)  # (H*BS, Dh)

            # Merge heads back into lanes: (H*BS, Dh) rows -> (BS, E) lanes.
            for h in range(n_head):
                o_sc[:, h * d_head:(h + 1) * d_head] = o2[h * bs:(h + 1) * bs, :]

            # ---- output projection: ONE (BS,E)@(E,E) matmul -------------------
            attn = (jnp.dot(o_sc[...].astype(MATMUL_DTYPE), wo_ref[l],
                            preferred_element_type=jnp.float32) + bo_ref[l])

            # ---- residual + post-norm -----------------------------------------
            r1 = _layer_norm(x + attn, g1_ref[l], be1_ref[l])

            # ---- feed-forward ---------------------------------------------------
            hid = jnp.maximum(
                jnp.dot(r1.astype(MATMUL_DTYPE), w1_ref[l],
                        preferred_element_type=jnp.float32) + bf1_ref[l], 0.0)
            ff = jnp.dot(hid.astype(MATMUL_DTYPE), w2_ref[l],
                         preferred_element_type=jnp.float32) + bf2_ref[l]
            x = _layer_norm(r1 + ff, g2_ref[l], be2_ref[l])

        if has_norm:
            x = _layer_norm(x, gn_ref[...], bn_ref[...])

        y_ref[...] = x.astype(y_ref.dtype)          # single whole-block store

    return kernel


# ---- wrapper ------------------------------------------------------------------
_LAYER_PARAM_ORDER = ("wqkv", "bqkv", "wo", "bo", "g1", "be1",
                      "w1", "bf1", "w2", "bf2", "g2", "be2")


def _prepare_layer_params(layer_params):
    """Stack per-layer params along L; fold 1/sqrt(Dh) into the Q columns;
    cast matmul weights to bf16 (biases / LN params stay f32)."""
    stk = lambda name: jnp.stack([p[name] for p in layer_params])
    scale = 1.0 / math.sqrt(D_HEAD)

    wqkv = stk("wqkv").at[:, :, :D_MODEL].multiply(scale)     # (L, E, 3E)
    bqkv = stk("bqkv").at[:, :, :D_MODEL].multiply(scale)     # (L, 1, 3E)

    w = lambda a: a.astype(MATMUL_DTYPE)
    return dict(
        wqkv=w(wqkv), bqkv=bqkv,
        wo=w(stk("wo")), bo=stk("bo"),
        g1=stk("g1"), be1=stk("be1"),
        w1=w(stk("w1")), bf1=stk("bf1"),
        w2=w(stk("w2")), bf2=stk("bf2"),
        g2=stk("g2"), be2=stk("be2"),
    )


def conformer_encoder_pallas(src, layer_params, norm_params,
                             attn_mask_add, key_pad_add):
    """Mirrors ConformerEncoder.forward: loop layers, then optional norm —
    all fused into a single pallas_call."""
    B, S, E = src.shape
    prep = _prepare_layer_params(layer_params)

    # Block-diagonal additive mask for the flattened (H*B*S, H*B*S) score
    # matrix: in-block (same head,batch) entries carry attn_mask + key padding,
    # off-block entries carry -1e9, so one row softmax == per-head softmax.
    N = N_HEAD * B
    combined = attn_mask_add[None, :, :] + key_pad_add                 # (B, S, S)
    per_n = jnp.broadcast_to(combined[None], (N_HEAD, B, S, S)).reshape(N, S, S)
    same = jnp.arange(N)[:, None] == jnp.arange(N)[None, :]            # (N, N)
    mask_full = jnp.where(same[:, None, :, None], per_n[:, :, None, :],
                          jnp.float32(NEG_MASK))
    mask_full = mask_full.reshape(N * S, N * S).astype(jnp.float32)

    has_norm = norm_params is not None
    kernel = _make_encoder_kernel(NUM_LAYERS, B, S, E, N_HEAD, has_norm)

    x2d = src.reshape(B * S, E).astype(jnp.float32)
    args = [x2d, mask_full] + [prep[n] for n in _LAYER_PARAM_ORDER]
    if has_norm:
        args += [norm_params["g"], norm_params["b"]]

    # Advisory cost so XLA schedules this custom call correctly in larger graphs.
    flops = 2 * NUM_LAYERS * (B * S * E * 3 * E                # QKV
                              + 2 * (N * S) * (N * S) * D_HEAD  # scores + PV
                              + B * S * E * E                   # out proj
                              + 2 * B * S * E * D_FF)           # FFN
    transc = NUM_LAYERS * ((N * S) * (N * S) + 2 * B * S) + (B * S if has_norm else 0)
    nbytes = sum(math.prod(a.shape) * a.dtype.itemsize for a in args) + B * S * E * 4
    cost = pl.CostEstimate(flops=flops, transcendentals=transc, bytes_accessed=nbytes)

    # TODO(synk): at production sizes, (a) add a "parallel" row-tile grid axis so
    # v7x's 2 TensorCores split B*S, (b) move the layer loop to an "arbitrary"
    # grid axis with per-layer weight BlockSpecs (double-buffered), and
    # (c) re-budget VMEM against v7x's 64 MiB via vmem_limit_bytes.  At
    # B=2,S=8,L=2 the grid-less fully fused form is faster (per-step grid
    # overhead would dominate).
    vmem = pl.BlockSpec(memory_space=pltpu.MemorySpace.VMEM)
    out = pl.pallas_call(
        kernel,
        out_shape=jax.ShapeDtypeStruct((B * S, E), jnp.float32),
        in_specs=[vmem] * len(args),
        out_specs=vmem,
        scratch_shapes=[pltpu.VMEM((B * S, 3 * E), jnp.float32),   # fused qkv slab
                        pltpu.VMEM((B * S, E), jnp.float32)],      # merged-head attn out
        input_output_aliases={0: 0},
        cost_estimate=cost,
    )(*args)
    return out.reshape(B, S, E).astype(src.dtype)


# ---- pure-JAX reference (same math, exact f32) for a sanity check ---------------
def _ref_layer(x, amask, kpm, p):
    qkv = x @ p["wqkv"] + p["bqkv"]
    q, k, v = qkv[:, :, :D_MODEL], qkv[:, :, D_MODEL:2 * D_MODEL], qkv[:, :, 2 * D_MODEL:]
    scale = 1.0 / (D_HEAD ** 0.5)
    outs = []
    for h in range(N_HEAD):
        sl = slice(h * D_HEAD, (h + 1) * D_HEAD)
        s = jnp.einsum("bqd,bkd->bqk", q[:, :, sl], k[:, :, sl]) * scale
        s = s + amask[None] + kpm
        pmat = jax.nn.softmax(s, axis=-1)
        outs.append(jnp.einsum("bqk,bkd->bqd", pmat, v[:, :, sl]))
    attn = jnp.concatenate(outs, axis=-1) @ p["wo"] + p["bo"]

    def ln(z, g, b):
        mu = jnp.mean(z, -1, keepdims=True)
        var = jnp.mean((z - mu) ** 2, -1, keepdims=True)
        return (z - mu) * jax.lax.rsqrt(var + LN_EPS) * g + b

    r1 = ln(x + attn, p["g1"], p["be1"])
    ff = jnp.maximum(r1 @ p["w1"] + p["bf1"], 0.0) @ p["w2"] + p["bf2"]
    return ln(r1 + ff, p["g2"], p["be2"])


def _ref_encoder(src, layer_params, norm_params, amask, kpm):
    out = src
    for p in layer_params:
        out = _ref_layer(out, amask, kpm, p)
    if norm_params is not None:
        mu = jnp.mean(out, -1, keepdims=True)
        var = jnp.mean((out - mu) ** 2, -1, keepdims=True)
        out = (out - mu) * jax.lax.rsqrt(var + LN_EPS) * norm_params["g"] + norm_params["b"]
    return out


# ---- deterministic parameter init ----------------------------------------------
def init_params(key):
    def nrm(k, shape, scale=0.05):
        return (scale * jax.random.normal(k, shape)).astype(jnp.float32)

    layers = []
    for _ in range(NUM_LAYERS):
        key, *ks = jax.random.split(key, 8)
        layers.append(dict(
            wqkv=nrm(ks[0], (D_MODEL, 3 * D_MODEL)),
            bqkv=nrm(ks[1], (1, 3 * D_MODEL)),
            wo=nrm(ks[2], (D_MODEL, D_MODEL)),
            bo=nrm(ks[3], (1, D_MODEL)),
            g1=jnp.ones((1, D_MODEL), jnp.float32),
            be1=jnp.zeros((1, D_MODEL), jnp.float32),
            w1=nrm(ks[4], (D_MODEL, D_FF)),
            bf1=nrm(ks[5], (1, D_FF)),
            w2=nrm(ks[6], (D_FF, D_MODEL)),
            bf2=jnp.zeros((1, D_MODEL), jnp.float32),
            g2=jnp.ones((1, D_MODEL), jnp.float32),
            be2=jnp.zeros((1, D_MODEL), jnp.float32),
        ))
    norm = dict(g=jnp.ones((1, D_MODEL), jnp.float32),
                b=jnp.zeros((1, D_MODEL), jnp.float32))
    return layers, norm, key


# ---- main -----------------------------------------------------------------------
if __name__ == "__main__":
    key = jax.random.PRNGKey(0)
    layer_params, norm_params, key = init_params(key)

    key, k_src = jax.random.split(key)
    src = jax.random.normal(k_src, (BATCH, SEQ, D_MODEL), dtype=jnp.float32)

    # src_mask=None -> additive zeros; src_key_padding_mask: pad last 2 tokens of
    # batch element 1 (True = padded -> large negative additive bias on keys).
    attn_mask_add = jnp.zeros((SEQ, SEQ), jnp.float32)
    pad_bool = jnp.zeros((BATCH, SEQ), bool).at[1, SEQ - 2:].set(True)
    key_pad_add = jnp.where(pad_bool, NEG_MASK, 0.0).astype(jnp.float32)[:, None, :]  # (B,1,S)

    run = jax.jit(conformer_encoder_pallas)
    out = jax.block_until_ready(run(src, layer_params, norm_params,
                                    attn_mask_add, key_pad_add))

    ref = _ref_encoder(src, layer_params, norm_params, attn_mask_add, key_pad_add)
    assert out.shape == (BATCH, SEQ, D_MODEL)
    # Softmax is exact; the only approximation is bf16 matmul operands
    # (f32 accumulate), ~2^-8 operand quantization -> observed error ~1e-3.
    # Set MATMUL_DTYPE = jnp.float32 for ~1e-5 parity.
    assert bool(jnp.allclose(out, ref, atol=1e-2, rtol=1e-2)), "mismatch vs JAX reference"

    print("KERNEL_OK")
</pallas_src>

<mosaic_0001>
module attributes {stable_mosaic.version = 11 : i64} {
  func.func @kernel(%arg0: memref<16x32xf32, #tpu.memory_space<vmem>>, %arg1: memref<64x64xf32, #tpu.memory_space<vmem>>, %arg2: memref<2x32x96xbf16, #tpu.memory_space<vmem>>, %arg3: memref<2x1x96xf32, #tpu.memory_space<vmem>>, %arg4: memref<2x32x32xbf16, #tpu.memory_space<vmem>>, %arg5: memref<2x1x32xf32, #tpu.memory_space<vmem>>, %arg6: memref<2x1x32xf32, #tpu.memory_space<vmem>>, %arg7: memref<2x1x32xf32, #tpu.memory_space<vmem>>, %arg8: memref<2x32x64xbf16, #tpu.memory_space<vmem>>, %arg9: memref<2x1x64xf32, #tpu.memory_space<vmem>>, %arg10: memref<2x64x32xbf16, #tpu.memory_space<vmem>>, %arg11: memref<2x1x32xf32, #tpu.memory_space<vmem>>, %arg12: memref<2x1x32xf32, #tpu.memory_space<vmem>>, %arg13: memref<2x1x32xf32, #tpu.memory_space<vmem>>, %arg14: memref<1x32xf32, #tpu.memory_space<vmem>>, %arg15: memref<1x32xf32, #tpu.memory_space<vmem>>, %arg16: memref<16x32xf32, #tpu.memory_space<vmem>>, %arg17: memref<16x96xf32, #tpu.memory_space<vmem>>, %arg18: memref<16x32xf32, #tpu.memory_space<vmem>>) attributes {dimension_semantics = [], scalar_prefetch = 0 : i64, scratch_operands = 2 : i64, tpu.core_type = #tpu.core_type<tc>} {
    %c0 = arith.constant 0 : index
    %c0_0 = arith.constant 0 : index
    %0 = vector.load %arg0[%c0, %c0_0] : memref<16x32xf32, #tpu.memory_space<vmem>>, vector<16x32xf32>
    %c0_1 = arith.constant 0 : index
    %c0_2 = arith.constant 0 : index
    %1 = vector.load %arg1[%c0_1, %c0_2] : memref<64x64xf32, #tpu.memory_space<vmem>>, vector<64x64xf32>
    %2 = arith.truncf %0 : vector<16x32xf32> to vector<16x32xbf16>
    %c0_3 = arith.constant 0 : index
    %c0_4 = arith.constant 0 : index
    %c0_5 = arith.constant 0 : index
    %3 = vector.load %arg2[%c0_3, %c0_4, %c0_5] : memref<2x32x96xbf16, #tpu.memory_space<vmem>>, vector<1x32x96xbf16>
    %4 = vector.shape_cast %3 : vector<1x32x96xbf16> to vector<32x96xbf16>
    %cst = arith.constant dense<0.000000e+00> : vector<16x96xf32>
    %5 = tpu.matmul %2, %4, %cst {dimension_numbers = #tpu.dot_dimension_numbers<[1], [0], [0], [1], [0, 0, 1, 1], [], []>} : vector<16x32xbf16>, vector<32x96xbf16>, vector<16x96xf32> -> vector<16x96xf32>
    %c0_6 = arith.constant 0 : index
    %c0_7 = arith.constant 0 : index
    %c0_8 = arith.constant 0 : index
    %6 = vector.load %arg3[%c0_6, %c0_7, %c0_8] : memref<2x1x96xf32, #tpu.memory_space<vmem>>, vector<1x1x96xf32>
    %7 = vector.shape_cast %6 : vector<1x1x96xf32> to vector<1x96xf32>
    %8 = vector.broadcast %7 : vector<1x96xf32> to vector<16x96xf32>
    %9 = arith.addf %5, %8 : vector<16x96xf32>
    %c0_9 = arith.constant 0 : index
    %c0_10 = arith.constant 0 : index
    %10 = vector.load %arg17[%c0_9, %c0_10] : memref<16x96xf32, #tpu.memory_space<vmem>>, vector<16x96xf32>
    tpu.vector_store %arg17[%c0_9, %c0_10], %9 {strides = array<i32>} : memref<16x96xf32, #tpu.memory_space<vmem>>, vector<16x96xf32>,
    %c0_11 = arith.constant 0 : index
    %c0_12 = arith.constant 0 : index
    %11 = vector.load %arg17[%c0_11, %c0_12] : memref<16x96xf32, #tpu.memory_space<vmem>>, vector<16x8xf32>
    %c0_13 = arith.constant 0 : index
    %c8 = arith.constant 8 : index
    %12 = vector.load %arg17[%c0_13, %c8] : memref<16x96xf32, #tpu.memory_space<vmem>>, vector<16x8xf32>
    %c0_14 = arith.constant 0 : index
    %c16 = arith.constant 16 : index
    %13 = vector.load %arg17[%c0_14, %c16] : memref<16x96xf32, #tpu.memory_space<vmem>>, vector<16x8xf32>
    %c0_15 = arith.constant 0 : index
    %c24 = arith.constant 24 : index
    %14 = vector.load %arg17[%c0_15, %c24] : memref<16x96xf32, #tpu.memory_space<vmem>>, vector<16x8xf32>
    %15 = tpu.concatenate %11, %12, %13, %14 in 0 : vector<16x8xf32>, vector<16x8xf32>, vector<16x8xf32>, vector<16x8xf32> -> vector<64x8xf32>
    %16 = arith.truncf %15 : vector<64x8xf32> to vector<64x8xbf16>
    %c0_16 = arith.constant 0 : index
    %c32 = arith.constant 32 : index
    %17 = vector.load %arg17[%c0_16, %c32] : memref<16x96xf32, #tpu.memory_space<vmem>>, vector<16x8xf32>
    %c0_17 = arith.constant 0 : index
    %c40 = arith.constant 40 : index
    %18 = vector.load %arg17[%c0_17, %c40] : memref<16x96xf32, #tpu.memory_space<vmem>>, vector<16x8xf32>
    %c0_18 = arith.constant 0 : index
    %c48 = arith.constant 48 : index
    %19 = vector.load %arg17[%c0_18, %c48] : memref<16x96xf32, #tpu.memory_space<vmem>>, vector<16x8xf32>
    %c0_19 = arith.constant 0 : index
    %c56 = arith.constant 56 : index
    %20 = vector.load %arg17[%c0_19, %c56] : memref<16x96xf32, #tpu.memory_space<vmem>>, vector<16x8xf32>
    %21 = tpu.concatenate %17, %18, %19, %20 in 0 : vector<16x8xf32>, vector<16x8xf32>, vector<16x8xf32>, vector<16x8xf32> -> vector<64x8xf32>
    %22 = arith.truncf %21 : vector<64x8xf32> to vector<64x8xbf16>
    %c0_20 = arith.constant 0 : index
    %c64 = arith.constant 64 : index
    %23 = vector.load %arg17[%c0_20, %c64] : memref<16x96xf32, #tpu.memory_space<vmem>>, vector<16x8xf32>
    %c0_21 = arith.constant 0 : index
    %c72 = arith.constant 72 : index
    %24 = vector.load %arg17[%c0_21, %c72] : memref<16x96xf32, #tpu.memory_space<vmem>>, vector<16x8xf32>
    %c0_22 = arith.constant 0 : index
    %c80 = arith.constant 80 : index
    %25 = vector.load %arg17[%c0_22, %c80] : memref<16x96xf32, #tpu.memory_space<vmem>>, vector<16x8xf32>
    %c0_23 = arith.constant 0 : index
    %c88 = arith.constant 88 : index
    %26 = vector.load %arg17[%c0_23, %c88] : memref<16x96xf32, #tpu.memory_space<vmem>>, vector<16x8xf32>
    %27 = tpu.concatenate %23, %24, %25, %26 in 0 : vector<16x8xf32>, vector<16x8xf32>, vector<16x8xf32>, vector<16x8xf32> -> vector<64x8xf32>
    %28 = arith.truncf %27 : vector<64x8xf32> to vector<64x8xbf16>
    "tpu.trace_start"() <{level = 10 : i32, message = "nd,md->nm"}> : () -> ()
    %cst_24 = arith.constant dense<0.000000e+00> : vector<64x64xf32>
    %29 = tpu.matmul %16, %22, %cst_24 {dimension_numbers = #tpu.dot_dimension_numbers<[1], [1], [0], [0], [0, 0, 1, 0], [], []>} : vector<64x8xbf16>, vector<64x8xbf16>, vector<64x64xf32> -> vector<64x64xf32>
    "tpu.trace_stop"() : () -> ()
    %30 = arith.addf %29, %1 : vector<64x64xf32>
    %cst_25 = arith.constant dense<0xFF800000> : vector<64xf32>
    %31 = vector.multi_reduction <maximumf>, %30, %cst_25 [1] : vector<64x64xf32> to vector<64xf32>
    %32 = vector.shape_cast %31 : vector<64xf32> to vector<64x1xf32>
    %33 = vector.broadcast %32 : vector<64x1xf32> to vector<64x64xf32>
    %34 = arith.subf %30, %33 : vector<64x64xf32>
    %35 = math.exp %34 : vector<64x64xf32>
    %cst_26 = arith.constant dense<0.000000e+00> : vector<64xf32>
    %36 = vector.multi_reduction <add>, %35, %cst_26 [1] : vector<64x64xf32> to vector<64xf32>
    %37 = vector.shape_cast %36 : vector<64xf32> to vector<64x1xf32>
    %38 = vector.broadcast %37 : vector<64x1xf32> to vector<64x64xf32>
    %39 = arith.divf %35, %38 : vector<64x64xf32>
    %40 = arith.truncf %39 : vector<64x64xf32> to vector<64x64xbf16>
    %cst_27 = arith.constant dense<0.000000e+00> : vector<64x8xf32>
    %41 = tpu.matmul %40, %28, %cst_27 {dimension_numbers = #tpu.dot_dimension_numbers<[1], [0], [0], [1], [0, 0, 1, 1], [], []>} : vector<64x64xbf16>, vector<64x8xbf16>, vector<64x8xf32> -> vector<64x8xf32>
    %42 = vector.extract_strided_slice %41 {offsets = [0, 0], sizes = [16, 8], strides = [1, 1]} : vector<64x8xf32> to vector<16x8xf32>
    %c0_28 = arith.constant 0 : index
    %c0_29 = arith.constant 0 : index
    %43 = vector.load %arg18[%c0_28, %c0_29] : memref<16x32xf32, #tpu.memory_space<vmem>>, vector<16x8xf32>
    tpu.vector_store %arg18[%c0_28, %c0_29], %42 {strides = array<i32>} : memref<16x32xf32, #tpu.memory_space<vmem>>, vector<16x8xf32>,
    %44 = vector.extract_strided_slice %41 {offsets = [16, 0], sizes = [16, 8], strides = [1, 1]} : vector<64x8xf32> to vector<16x8xf32>
    %c0_30 = arith.constant 0 : index
    %c8_31 = arith.constant 8 : index
    %45 = vector.load %arg18[%c0_30, %c8_31] : memref<16x32xf32, #tpu.memory_space<vmem>>, vector<16x8xf32>
    tpu.vector_store %arg18[%c0_30, %c8_31], %44 {strides = array<i32>} : memref<16x32xf32, #tpu.memory_space<vmem>>, vector<16x8xf32>,
    %46 = vector.extract_strided_slice %41 {offsets = [32, 0], sizes = [16, 8], strides = [1, 1]} : vector<64x8xf32> to vector<16x8xf32>
    %c0_32 = arith.constant 0 : index
    %c16_33 = arith.constant 16 : index
    %47 = vector.load %arg18[%c0_32, %c16_33] : memref<16x32xf32, #tpu.memory_space<vmem>>, vector<16x8xf32>
    tpu.vector_store %arg18[%c0_32, %c16_33], %46 {strides = array<i32>} : memref<16x32xf32, #tpu.memory_space<vmem>>, vector<16x8xf32>,
    %48 = vector.extract_strided_slice %41 {offsets = [48, 0], sizes = [16, 8], strides = [1, 1]} : vector<64x8xf32> to vector<16x8xf32>
    %c0_34 = arith.constant 0 : index
    %c24_35 = arith.constant 24 : index
    %49 = vector.load %arg18[%c0_34, %c24_35] : memref<16x32xf32, #tpu.memory_space<vmem>>, vector<16x8xf32>
    tpu.vector_store %arg18[%c0_34, %c24_35], %48 {strides = array<i32>} : memref<16x32xf32, #tpu.memory_space<vmem>>, vector<16x8xf32>,
    %c0_36 = arith.constant 0 : index
    %c0_37 = arith.constant 0 : index
    %50 = vector.load %arg18[%c0_36, %c0_37] : memref<16x32xf32, #tpu.memory_space<vmem>>, vector<16x32xf32>
    %51 = arith.truncf %50 : vector<16x32xf32> to vector<16x32xbf16>
    %c0_38 = arith.constant 0 : index
    %c0_39 = arith.constant 0 : index
    %c0_40 = arith.constant 0 : index
    %52 = vector.load %arg4[%c0_38, %c0_39, %c0_40] : memref<2x32x32xbf16, #tpu.memory_space<vmem>>, vector<1x32x32xbf16>
    %53 = vector.shape_cast %52 : vector<1x32x32xbf16> to vector<32x32xbf16>
    %cst_41 = arith.constant dense<0.000000e+00> : vector<16x32xf32>
    %54 = tpu.matmul %51, %53, %cst_41 {dimension_numbers = #tpu.dot_dimension_numbers<[1], [0], [0], [1], [0, 0, 1, 1], [], []>} : vector<16x32xbf16>, vector<32x32xbf16>, vector<16x32xf32> -> vector<16x32xf32>
    %c0_42 = arith.constant 0 : index
    %c0_43 = arith.constant 0 : index
    %c0_44 = arith.constant 0 : index
    %55 = vector.load %arg5[%c0_42, %c0_43, %c0_44] : memref<2x1x32xf32, #tpu.memory_space<vmem>>, vector<1x1x32xf32>
    %56 = vector.shape_cast %55 : vector<1x1x32xf32> to vector<1x32xf32>
    %57 = vector.broadcast %56 : vector<1x32xf32> to vector<16x32xf32>
    %58 = arith.addf %54, %57 : vector<16x32xf32>
    %59 = arith.addf %0, %58 : vector<16x32xf32>
    %c0_45 = arith.constant 0 : index
    %c0_46 = arith.constant 0 : index
    %c0_47 = arith.constant 0 : index
    %60 = vector.load %arg6[%c0_45, %c0_46, %c0_47] : memref<2x1x32xf32, #tpu.memory_space<vmem>>, vector<1x1x32xf32>
    %61 = vector.shape_cast %60 : vector<1x1x32xf32> to vector<1x32xf32>
    %c0_48 = arith.constant 0 : index
    %c0_49 = arith.constant 0 : index
    %c0_50 = arith.constant 0 : index
    %62 = vector.load %arg7[%c0_48, %c0_49, %c0_50] : memref<2x1x32xf32, #tpu.memory_space<vmem>>, vector<1x1x32xf32>
    %63 = vector.shape_cast %62 : vector<1x1x32xf32> to vector<1x32xf32>
    %cst_51 = arith.constant dense<0.000000e+00> : vector<16xf32>
    %64 = vector.multi_reduction <add>, %59, %cst_51 [1] : vector<16x32xf32> to vector<16xf32>
    %65 = vector.shape_cast %64 : vector<16xf32> to vector<16x1xf32>
    %cst_52 = arith.constant 3.200000e+01 : f32
    %66 = vector.broadcast %cst_52 : f32 to vector<16x1xf32>
    %67 = arith.divf %65, %66 : vector<16x1xf32>
    %68 = vector.broadcast %67 : vector<16x1xf32> to vector<16x32xf32>
    %69 = arith.subf %59, %68 : vector<16x32xf32>
    %70 = arith.mulf %69, %69 : vector<16x32xf32>
    %cst_53 = arith.constant dense<0.000000e+00> : vector<16xf32>
    %71 = vector.multi_reduction <add>, %70, %cst_53 [1] : vector<16x32xf32> to vector<16xf32>
    %72 = vector.shape_cast %71 : vector<16xf32> to vector<16x1xf32>
    %cst_54 = arith.constant 3.200000e+01 : f32
    %73 = vector.broadcast %cst_54 : f32 to vector<16x1xf32>
    %74 = arith.divf %72, %73 : vector<16x1xf32>
    %75 = vector.broadcast %67 : vector<16x1xf32> to vector<16x32xf32>
    %76 = arith.subf %59, %75 : vector<16x32xf32>
    %cst_55 = arith.constant 9.99999974E-6 : f32
    %77 = vector.broadcast %cst_55 : f32 to vector<16x1xf32>
    %78 = arith.addf %74, %77 : vector<16x1xf32>
    %79 = math.rsqrt %78 : vector<16x1xf32>
    %80 = vector.broadcast %79 : vector<16x1xf32> to vector<16x32xf32>
    %81 = arith.mulf %76, %80 : vector<16x32xf32>
    %82 = vector.broadcast %61 : vector<1x32xf32> to vector<16x32xf32>
    %83 = arith.mulf %81, %82 : vector<16x32xf32>
    %84 = vector.broadcast %63 : vector<1x32xf32> to vector<16x32xf32>
    %85 = arith.addf %83, %84 : vector<16x32xf32>
    %86 = arith.truncf %85 : vector<16x32xf32> to vector<16x32xbf16>
    %c0_56 = arith.constant 0 : index
    %c0_57 = arith.constant 0 : index
    %c0_58 = arith.constant 0 : index
    %87 = vector.load %arg8[%c0_56, %c0_57, %c0_58] : memref<2x32x64xbf16, #tpu.memory_space<vmem>>, vector<1x32x64xbf16>
    %88 = vector.shape_cast %87 : vector<1x32x64xbf16> to vector<32x64xbf16>
    %cst_59 = arith.constant dense<0.000000e+00> : vector<16x64xf32>
    %89 = tpu.matmul %86, %88, %cst_59 {dimension_numbers = #tpu.dot_dimension_numbers<[1], [0], [0], [1], [0, 0, 1, 1], [], []>} : vector<16x32xbf16>, vector<32x64xbf16>, vector<16x64xf32> -> vector<16x64xf32>
    %c0_60 = arith.constant 0 : index
    %c0_61 = arith.constant 0 : index
    %c0_62 = arith.constant 0 : index
    %90 = vector.load %arg9[%c0_60, %c0_61, %c0_62] : memref<2x1x64xf32, #tpu.memory_space<vmem>>, vector<1x1x64xf32>
    %91 = vector.shape_cast %90 : vector<1x1x64xf32> to vector<1x64xf32>
    %92 = vector.broadcast %91 : vector<1x64xf32> to vector<16x64xf32>
    %93 = arith.addf %89, %92 : vector<16x64xf32>
    %cst_63 = arith.constant 0.000000e+00 : f32
    %94 = vector.broadcast %cst_63 : f32 to vector<16x64xf32>
    %95 = arith.maximumf %93, %94 : vector<16x64xf32>
    %96 = arith.truncf %95 : vector<16x64xf32> to vector<16x64xbf16>
    %c0_64 = arith.constant 0 : index
    %c0_65 = arith.constant 0 : index
    %c0_66 = arith.constant 0 : index
    %97 = vector.load %arg10[%c0_64, %c0_65, %c0_66] : memref<2x64x32xbf16, #tpu.memory_space<vmem>>, vector<1x64x32xbf16>
    %98 = vector.shape_cast %97 : vector<1x64x32xbf16> to vector<64x32xbf16>
    %cst_67 = arith.constant dense<0.000000e+00> : vector<16x32xf32>
    %99 = tpu.matmul %96, %98, %cst_67 {dimension_numbers = #tpu.dot_dimension_numbers<[1], [0], [0], [1], [0, 0, 1, 1], [], []>} : vector<16x64xbf16>, vector<64x32xbf16>, vector<16x32xf32> -> vector<16x32xf32>
    %c0_68 = arith.constant 0 : index
    %c0_69 = arith.constant 0 : index
    %c0_70 = arith.constant 0 : index
    %100 = vector.load %arg11[%c0_68, %c0_69, %c0_70] : memref<2x1x32xf32, #tpu.memory_space<vmem>>, vector<1x1x32xf32>
    %101 = vector.shape_cast %100 : vector<1x1x32xf32> to vector<1x32xf32>
    %102 = vector.broadcast %101 : vector<1x32xf32> to vector<16x32xf32>
    %103 = arith.addf %99, %102 : vector<16x32xf32>
    %104 = arith.addf %85, %103 : vector<16x32xf32>
    %c0_71 = arith.constant 0 : index
    %c0_72 = arith.constant 0 : index
    %c0_73 = arith.constant 0 : index
    %105 = vector.load %arg12[%c0_71, %c0_72, %c0_73] : memref<2x1x32xf32, #tpu.memory_space<vmem>>, vector<1x1x32xf32>
    %106 = vector.shape_cast %105 : vector<1x1x32xf32> to vector<1x32xf32>
    %c0_74 = arith.constant 0 : index
    %c0_75 = arith.constant 0 : index
    %c0_76 = arith.constant 0 : index
    %107 = vector.load %arg13[%c0_74, %c0_75, %c0_76] : memref<2x1x32xf32, #tpu.memory_space<vmem>>, vector<1x1x32xf32>
    %108 = vector.shape_cast %107 : vector<1x1x32xf32> to vector<1x32xf32>
    %cst_77 = arith.constant dense<0.000000e+00> : vector<16xf32>
    %109 = vector.multi_reduction <add>, %104, %cst_77 [1] : vector<16x32xf32> to vector<16xf32>
    %110 = vector.shape_cast %109 : vector<16xf32> to vector<16x1xf32>
    %cst_78 = arith.constant 3.200000e+01 : f32
    %111 = vector.broadcast %cst_78 : f32 to vector<16x1xf32>
    %112 = arith.divf %110, %111 : vector<16x1xf32>
    %113 = vector.broadcast %112 : vector<16x1xf32> to vector<16x32xf32>
    %114 = arith.subf %104, %113 : vector<16x32xf32>
    %115 = arith.mulf %114, %114 : vector<16x32xf32>
    %cst_79 = arith.constant dense<0.000000e+00> : vector<16xf32>
    %116 = vector.multi_reduction <add>, %115, %cst_79 [1] : vector<16x32xf32> to vector<16xf32>
    %117 = vector.shape_cast %116 : vector<16xf32> to vector<16x1xf32>
    %cst_80 = arith.constant 3.200000e+01 : f32
    %118 = vector.broadcast %cst_80 : f32 to vector<16x1xf32>
    %119 = arith.divf %117, %118 : vector<16x1xf32>
    %120 = vector.broadcast %112 : vector<16x1xf32> to vector<16x32xf32>
    %121 = arith.subf %104, %120 : vector<16x32xf32>
    %cst_81 = arith.constant 9.99999974E-6 : f32
    %122 = vector.broadcast %cst_81 : f32 to vector<16x1xf32>
    %123 = arith.addf %119, %122 : vector<16x1xf32>
    %124 = math.rsqrt %123 : vector<16x1xf32>
    %125 = vector.broadcast %124 : vector<16x1xf32> to vector<16x32xf32>
    %126 = arith.mulf %121, %125 : vector<16x32xf32>
    %127 = vector.broadcast %106 : vector<1x32xf32> to vector<16x32xf32>
    %128 = arith.mulf %126, %127 : vector<16x32xf32>
    %129 = vector.broadcast %108 : vector<1x32xf32> to vector<16x32xf32>
    %130 = arith.addf %128, %129 : vector<16x32xf32>
    %131 = arith.truncf %130 : vector<16x32xf32> to vector<16x32xbf16>
    %c1 = arith.constant 1 : index
    %c0_82 = arith.constant 0 : index
    %c0_83 = arith.constant 0 : index
    %132 = vector.load %arg2[%c1, %c0_82, %c0_83] : memref<2x32x96xbf16, #tpu.memory_space<vmem>>, vector<1x32x96xbf16>
    %133 = vector.shape_cast %132 : vector<1x32x96xbf16> to vector<32x96xbf16>
    %cst_84 = arith.constant dense<0.000000e+00> : vector<16x96xf32>
    %134 = tpu.matmul %131, %133, %cst_84 {dimension_numbers = #tpu.dot_dimension_numbers<[1], [0], [0], [1], [0, 0, 1, 1], [], []>} : vector<16x32xbf16>, vector<32x96xbf16>, vector<16x96xf32> -> vector<16x96xf32>
    %c1_85 = arith.constant 1 : index
    %c0_86 = arith.constant 0 : index
    %c0_87 = arith.constant 0 : index
    %135 = vector.load %arg3[%c1_85, %c0_86, %c0_87] : memref<2x1x96xf32, #tpu.memory_space<vmem>>, vector<1x1x96xf32>
    %136 = vector.shape_cast %135 : vector<1x1x96xf32> to vector<1x96xf32>
    %137 = vector.broadcast %136 : vector<1x96xf32> to vector<16x96xf32>
    %138 = arith.addf %134, %137 : vector<16x96xf32>
    %c0_88 = arith.constant 0 : index
    %c0_89 = arith.constant 0 : index
    %139 = vector.load %arg17[%c0_88, %c0_89] : memref<16x96xf32, #tpu.memory_space<vmem>>, vector<16x96xf32>
    tpu.vector_store %arg17[%c0_88, %c0_89], %138 {strides = array<i32>} : memref<16x96xf32, #tpu.memory_space<vmem>>, vector<16x96xf32>,
    %c0_90 = arith.constant 0 : index
    %c0_91 = arith.constant 0 : index
    %140 = vector.load %arg17[%c0_90, %c0_91] : memref<16x96xf32, #tpu.memory_space<vmem>>, vector<16x8xf32>
    %c0_92 = arith.constant 0 : index
    %c8_93 = arith.constant 8 : index
    %141 = vector.load %arg17[%c0_92, %c8_93] : memref<16x96xf32, #tpu.memory_space<vmem>>, vector<16x8xf32>
    %c0_94 = arith.constant 0 : index
    %c16_95 = arith.constant 16 : index
    %142 = vector.load %arg17[%c0_94, %c16_95] : memref<16x96xf32, #tpu.memory_space<vmem>>, vector<16x8xf32>
    %c0_96 = arith.constant 0 : index
    %c24_97 = arith.constant 24 : index
    %143 = vector.load %arg17[%c0_96, %c24_97] : memref<16x96xf32, #tpu.memory_space<vmem>>, vector<16x8xf32>
    %144 = tpu.concatenate %140, %141, %142, %143 in 0 : vector<16x8xf32>, vector<16x8xf32>, vector<16x8xf32>, vector<16x8xf32> -> vector<64x8xf32>
    %145 = arith.truncf %144 : vector<64x8xf32> to vector<64x8xbf16>
    %c0_98 = arith.constant 0 : index
    %c32_99 = arith.constant 32 : index
    %146 = vector.load %arg17[%c0_98, %c32_99] : memref<16x96xf32, #tpu.memory_space<vmem>>, vector<16x8xf32>
    %c0_100 = arith.constant 0 : index
    %c40_101 = arith.constant 40 : index
    %147 = vector.load %arg17[%c0_100, %c40_101] : memref<16x96xf32, #tpu.memory_space<vmem>>, vector<16x8xf32>
    %c0_102 = arith.constant 0 : index
    %c48_103 = arith.constant 48 : index
    %148 = vector.load %arg17[%c0_102, %c48_103] : memref<16x96xf32, #tpu.memory_space<vmem>>, vector<16x8xf32>
    %c0_104 = arith.constant 0 : index
    %c56_105 = arith.constant 56 : index
    %149 = vector.load %arg17[%c0_104, %c56_105] : memref<16x96xf32, #tpu.memory_space<vmem>>, vector<16x8xf32>
    %150 = tpu.concatenate %146, %147, %148, %149 in 0 : vector<16x8xf32>, vector<16x8xf32>, vector<16x8xf32>, vector<16x8xf32> -> vector<64x8xf32>
    %151 = arith.truncf %150 : vector<64x8xf32> to vector<64x8xbf16>
    %c0_106 = arith.constant 0 : index
    %c64_107 = arith.constant 64 : index
    %152 = vector.load %arg17[%c0_106, %c64_107] : memref<16x96xf32, #tpu.memory_space<vmem>>, vector<16x8xf32>
    %c0_108 = arith.constant 0 : index
    %c72_109 = arith.constant 72 : index
    %153 = vector.load %arg17[%c0_108, %c72_109] : memref<16x96xf32, #tpu.memory_space<vmem>>, vector<16x8xf32>
    %c0_110 = arith.constant 0 : index
    %c80_111 = arith.constant 80 : index
    %154 = vector.load %arg17[%c0_110, %c80_111] : memref<16x96xf32, #tpu.memory_space<vmem>>, vector<16x8xf32>
    %c0_112 = arith.constant 0 : index
    %c88_113 = arith.constant 88 : index
    %155 = vector.load %arg17[%c0_112, %c88_113] : memref<16x96xf32, #tpu.memory_space<vmem>>, vector<16x8xf32>
    %156 = tpu.concatenate %152, %153, %154, %155 in 0 : vector<16x8xf32>, vector<16x8xf32>, vector<16x8xf32>, vector<16x8xf32> -> vector<64x8xf32>
    %157 = arith.truncf %156 : vector<64x8xf32> to vector<64x8xbf16>
    "tpu.trace_start"() <{level = 10 : i32, message = "nd,md->nm"}> : () -> ()
    %cst_114 = arith.constant dense<0.000000e+00> : vector<64x64xf32>
    %158 = tpu.matmul %145, %151, %cst_114 {dimension_numbers = #tpu.dot_dimension_numbers<[1], [1], [0], [0], [0, 0, 1, 0], [], []>} : vector<64x8xbf16>, vector<64x8xbf16>, vector<64x64xf32> -> vector<64x64xf32>
    "tpu.trace_stop"() : () -> ()
    %159 = arith.addf %158, %1 : vector<64x64xf32>
    %cst_115 = arith.constant dense<0xFF800000> : vector<64xf32>
    %160 = vector.multi_reduction <maximumf>, %159, %cst_115 [1] : vector<64x64xf32> to vector<64xf32>
    %161 = vector.shape_cast %160 : vector<64xf32> to vector<64x1xf32>
    %162 = vector.broadcast %161 : vector<64x1xf32> to vector<64x64xf32>
    %163 = arith.subf %159, %162 : vector<64x64xf32>
    %164 = math.exp %163 : vector<64x64xf32>
    %cst_116 = arith.constant dense<0.000000e+00> : vector<64xf32>
    %165 = vector.multi_reduction <add>, %164, %cst_116 [1] : vector<64x64xf32> to vector<64xf32>
    %166 = vector.shape_cast %165 : vector<64xf32> to vector<64x1xf32>
    %167 = vector.broadcast %166 : vector<64x1xf32> to vector<64x64xf32>
    %168 = arith.divf %164, %167 : vector<64x64xf32>
    %169 = arith.truncf %168 : vector<64x64xf32> to vector<64x64xbf16>
    %cst_117 = arith.constant dense<0.000000e+00> : vector<64x8xf32>
    %170 = tpu.matmul %169, %157, %cst_117 {dimension_numbers = #tpu.dot_dimension_numbers<[1], [0], [0], [1], [0, 0, 1, 1], [], []>} : vector<64x64xbf16>, vector<64x8xbf16>, vector<64x8xf32> -> vector<64x8xf32>
    %171 = vector.extract_strided_slice %170 {offsets = [0, 0], sizes = [16, 8], strides = [1, 1]} : vector<64x8xf32> to vector<16x8xf32>
    %c0_118 = arith.constant 0 : index
    %c0_119 = arith.constant 0 : index
    %172 = vector.load %arg18[%c0_118, %c0_119] : memref<16x32xf32, #tpu.memory_space<vmem>>, vector<16x8xf32>
    tpu.vector_store %arg18[%c0_118, %c0_119], %171 {strides = array<i32>} : memref<16x32xf32, #tpu.memory_space<vmem>>, vector<16x8xf32>,
    %173 = vector.extract_strided_slice %170 {offsets = [16, 0], sizes = [16, 8], strides = [1, 1]} : vector<64x8xf32> to vector<16x8xf32>
    %c0_120 = arith.constant 0 : index
    %c8_121 = arith.constant 8 : index
    %174 = vector.load %arg18[%c0_120, %c8_121] : memref<16x32xf32, #tpu.memory_space<vmem>>, vector<16x8xf32>
    tpu.vector_store %arg18[%c0_120, %c8_121], %173 {strides = array<i32>} : memref<16x32xf32, #tpu.memory_space<vmem>>, vector<16x8xf32>,
    %175 = vector.extract_strided_slice %170 {offsets = [32, 0], sizes = [16, 8], strides = [1, 1]} : vector<64x8xf32> to vector<16x8xf32>
    %c0_122 = arith.constant 0 : index
    %c16_123 = arith.constant 16 : index
    %176 = vector.load %arg18[%c0_122, %c16_123] : memref<16x32xf32, #tpu.memory_space<vmem>>, vector<16x8xf32>
    tpu.vector_store %arg18[%c0_122, %c16_123], %175 {strides = array<i32>} : memref<16x32xf32, #tpu.memory_space<vmem>>, vector<16x8xf32>,
    %177 = vector.extract_strided_slice %170 {offsets = [48, 0], sizes = [16, 8], strides = [1, 1]} : vector<64x8xf32> to vector<16x8xf32>
    %c0_124 = arith.constant 0 : index
    %c24_125 = arith.constant 24 : index
    %178 = vector.load %arg18[%c0_124, %c24_125] : memref<16x32xf32, #tpu.memory_space<vmem>>, vector<16x8xf32>
    tpu.vector_store %arg18[%c0_124, %c24_125], %177 {strides = array<i32>} : memref<16x32xf32, #tpu.memory_space<vmem>>, vector<16x8xf32>,
    %c0_126 = arith.constant 0 : index
    %c0_127 = arith.constant 0 : index
    %179 = vector.load %arg18[%c0_126, %c0_127] : memref<16x32xf32, #tpu.memory_space<vmem>>, vector<16x32xf32>
    %180 = arith.truncf %179 : vector<16x32xf32> to vector<16x32xbf16>
    %c1_128 = arith.constant 1 : index
    %c0_129 = arith.constant 0 : index
    %c0_130 = arith.constant 0 : index
    %181 = vector.load %arg4[%c1_128, %c0_129, %c0_130] : memref<2x32x32xbf16, #tpu.memory_space<vmem>>, vector<1x32x32xbf16>
    %182 = vector.shape_cast %181 : vector<1x32x32xbf16> to vector<32x32xbf16>
    %cst_131 = arith.constant dense<0.000000e+00> : vector<16x32xf32>
    %183 = tpu.matmul %180, %182, %cst_131 {dimension_numbers = #tpu.dot_dimension_numbers<[1], [0], [0], [1], [0, 0, 1, 1], [], []>} : vector<16x32xbf16>, vector<32x32xbf16>, vector<16x32xf32> -> vector<16x32xf32>
    %c1_132 = arith.constant 1 : index
    %c0_133 = arith.constant 0 : index
    %c0_134 = arith.constant 0 : index
    %184 = vector.load %arg5[%c1_132, %c0_133, %c0_134] : memref<2x1x32xf32, #tpu.memory_space<vmem>>, vector<1x1x32xf32>
    %185 = vector.shape_cast %184 : vector<1x1x32xf32> to vector<1x32xf32>
    %186 = vector.broadcast %185 : vector<1x32xf32> to vector<16x32xf32>
    %187 = arith.addf %183, %186 : vector<16x32xf32>
    %188 = arith.addf %130, %187 : vector<16x32xf32>
    %c1_135 = arith.constant 1 : index
    %c0_136 = arith.constant 0 : index
    %c0_137 = arith.constant 0 : index
    %189 = vector.load %arg6[%c1_135, %c0_136, %c0_137] : memref<2x1x32xf32, #tpu.memory_space<vmem>>, vector<1x1x32xf32>
    %190 = vector.shape_cast %189 : vector<1x1x32xf32> to vector<1x32xf32>
    %c1_138 = arith.constant 1 : index
    %c0_139 = arith.constant 0 : index
    %c0_140 = arith.constant 0 : index
    %191 = vector.load %arg7[%c1_138, %c0_139, %c0_140] : memref<2x1x32xf32, #tpu.memory_space<vmem>>, vector<1x1x32xf32>
    %192 = vector.shape_cast %191 : vector<1x1x32xf32> to vector<1x32xf32>
    %cst_141 = arith.constant dense<0.000000e+00> : vector<16xf32>
    %193 = vector.multi_reduction <add>, %188, %cst_141 [1] : vector<16x32xf32> to vector<16xf32>
    %194 = vector.shape_cast %193 : vector<16xf32> to vector<16x1xf32>
    %cst_142 = arith.constant 3.200000e+01 : f32
    %195 = vector.broadcast %cst_142 : f32 to vector<16x1xf32>
    %196 = arith.divf %194, %195 : vector<16x1xf32>
    %197 = vector.broadcast %196 : vector<16x1xf32> to vector<16x32xf32>
    %198 = arith.subf %188, %197 : vector<16x32xf32>
    %199 = arith.mulf %198, %198 : vector<16x32xf32>
    %cst_143 = arith.constant dense<0.000000e+00> : vector<16xf32>
    %200 = vector.multi_reduction <add>, %199, %cst_143 [1] : vector<16x32xf32> to vector<16xf32>
    %201 = vector.shape_cast %200 : vector<16xf32> to vector<16x1xf32>
    %cst_144 = arith.constant 3.200000e+01 : f32
    %202 = vector.broadcast %cst_144 : f32 to vector<16x1xf32>
    %203 = arith.divf %201, %202 : vector<16x1xf32>
    %204 = vector.broadcast %196 : vector<16x1xf32> to vector<16x32xf32>
    %205 = arith.subf %188, %204 : vector<16x32xf32>
    %cst_145 = arith.constant 9.99999974E-6 : f32
    %206 = vector.broadcast %cst_145 : f32 to vector<16x1xf32>
    %207 = arith.addf %203, %206 : vector<16x1xf32>
    %208 = math.rsqrt %207 : vector<16x1xf32>
    %209 = vector.broadcast %208 : vector<16x1xf32> to vector<16x32xf32>
    %210 = arith.mulf %205, %209 : vector<16x32xf32>
    %211 = vector.broadcast %190 : vector<1x32xf32> to vector<16x32xf32>
    %212 = arith.mulf %210, %211 : vector<16x32xf32>
    %213 = vector.broadcast %192 : vector<1x32xf32> to vector<16x32xf32>
    %214 = arith.addf %212, %213 : vector<16x32xf32>
    %215 = arith.truncf %214 : vector<16x32xf32> to vector<16x32xbf16>
    %c1_146 = arith.constant 1 : index
    %c0_147 = arith.constant 0 : index
    %c0_148 = arith.constant 0 : index
    %216 = vector.load %arg8[%c1_146, %c0_147, %c0_148] : memref<2x32x64xbf16, #tpu.memory_space<vmem>>, vector<1x32x64xbf16>
    %217 = vector.shape_cast %216 : vector<1x32x64xbf16> to vector<32x64xbf16>
    %cst_149 = arith.constant dense<0.000000e+00> : vector<16x64xf32>
    %218 = tpu.matmul %215, %217, %cst_149 {dimension_numbers = #tpu.dot_dimension_numbers<[1], [0], [0], [1], [0, 0, 1, 1], [], []>} : vector<16x32xbf16>, vector<32x64xbf16>, vector<16x64xf32> -> vector<16x64xf32>
    %c1_150 = arith.constant 1 : index
    %c0_151 = arith.constant 0 : index
    %c0_152 = arith.constant 0 : index
    %219 = vector.load %arg9[%c1_150, %c0_151, %c0_152] : memref<2x1x64xf32, #tpu.memory_space<vmem>>, vector<1x1x64xf32>
    %220 = vector.shape_cast %219 : vector<1x1x64xf32> to vector<1x64xf32>
    %221 = vector.broadcast %220 : vector<1x64xf32> to vector<16x64xf32>
    %222 = arith.addf %218, %221 : vector<16x64xf32>
    %cst_153 = arith.constant 0.000000e+00 : f32
    %223 = vector.broadcast %cst_153 : f32 to vector<16x64xf32>
    %224 = arith.maximumf %222, %223 : vector<16x64xf32>
    %225 = arith.truncf %224 : vector<16x64xf32> to vector<16x64xbf16>
    %c1_154 = arith.constant 1 : index
    %c0_155 = arith.constant 0 : index
    %c0_156 = arith.constant 0 : index
    %226 = vector.load %arg10[%c1_154, %c0_155, %c0_156] : memref<2x64x32xbf16, #tpu.memory_space<vmem>>, vector<1x64x32xbf16>
    %227 = vector.shape_cast %226 : vector<1x64x32xbf16> to vector<64x32xbf16>
    %cst_157 = arith.constant dense<0.000000e+00> : vector<16x32xf32>
    %228 = tpu.matmul %225, %227, %cst_157 {dimension_numbers = #tpu.dot_dimension_numbers<[1], [0], [0], [1], [0, 0, 1, 1], [], []>} : vector<16x64xbf16>, vector<64x32xbf16>, vector<16x32xf32> -> vector<16x32xf32>
    %c1_158 = arith.constant 1 : index
    %c0_159 = arith.constant 0 : index
    %c0_160 = arith.constant 0 : index
    %229 = vector.load %arg11[%c1_158, %c0_159, %c0_160] : memref<2x1x32xf32, #tpu.memory_space<vmem>>, vector<1x1x32xf32>
    %230 = vector.shape_cast %229 : vector<1x1x32xf32> to vector<1x32xf32>
    %231 = vector.broadcast %230 : vector<1x32xf32> to vector<16x32xf32>
    %232 = arith.addf %228, %231 : vector<16x32xf32>
    %233 = arith.addf %214, %232 : vector<16x32xf32>
    %c1_161 = arith.constant 1 : index
    %c0_162 = arith.constant 0 : index
    %c0_163 = arith.constant 0 : index
    %234 = vector.load %arg12[%c1_161, %c0_162, %c0_163] : memref<2x1x32xf32, #tpu.memory_space<vmem>>, vector<1x1x32xf32>
    %235 = vector.shape_cast %234 : vector<1x1x32xf32> to vector<1x32xf32>
    %c1_164 = arith.constant 1 : index
    %c0_165 = arith.constant 0 : index
    %c0_166 = arith.constant 0 : index
    %236 = vector.load %arg13[%c1_164, %c0_165, %c0_166] : memref<2x1x32xf32, #tpu.memory_space<vmem>>, vector<1x1x32xf32>
    %237 = vector.shape_cast %236 : vector<1x1x32xf32> to vector<1x32xf32>
    %cst_167 = arith.constant dense<0.000000e+00> : vector<16xf32>
    %238 = vector.multi_reduction <add>, %233, %cst_167 [1] : vector<16x32xf32> to vector<16xf32>
    %239 = vector.shape_cast %238 : vector<16xf32> to vector<16x1xf32>
    %cst_168 = arith.constant 3.200000e+01 : f32
    %240 = vector.broadcast %cst_168 : f32 to vector<16x1xf32>
    %241 = arith.divf %239, %240 : vector<16x1xf32>
    %242 = vector.broadcast %241 : vector<16x1xf32> to vector<16x32xf32>
    %243 = arith.subf %233, %242 : vector<16x32xf32>
    %244 = arith.mulf %243, %243 : vector<16x32xf32>
    %cst_169 = arith.constant dense<0.000000e+00> : vector<16xf32>
    %245 = vector.multi_reduction <add>, %244, %cst_169 [1] : vector<16x32xf32> to vector<16xf32>
    %246 = vector.shape_cast %245 : vector<16xf32> to vector<16x1xf32>
    %cst_170 = arith.constant 3.200000e+01 : f32
    %247 = vector.broadcast %cst_170 : f32 to vector<16x1xf32>
    %248 = arith.divf %246, %247 : vector<16x1xf32>
    %249 = vector.broadcast %241 : vector<16x1xf32> to vector<16x32xf32>
    %250 = arith.subf %233, %249 : vector<16x32xf32>
    %cst_171 = arith.constant 9.99999974E-6 : f32
    %251 = vector.broadcast %cst_171 : f32 to vector<16x1xf32>
    %252 = arith.addf %248, %251 : vector<16x1xf32>
    %253 = math.rsqrt %252 : vector<16x1xf32>
    %254 = vector.broadcast %253 : vector<16x1xf32> to vector<16x32xf32>
    %255 = arith.mulf %250, %254 : vector<16x32xf32>
    %256 = vector.broadcast %235 : vector<1x32xf32> to vector<16x32xf32>
    %257 = arith.mulf %255, %256 : vector<16x32xf32>
    %258 = vector.broadcast %237 : vector<1x32xf32> to vector<16x32xf32>
    %259 = arith.addf %257, %258 : vector<16x32xf32>
    %c0_172 = arith.constant 0 : index
    %c0_173 = arith.constant 0 : index
    %260 = vector.load %arg14[%c0_172, %c0_173] : memref<1x32xf32, #tpu.memory_space<vmem>>, vector<1x32xf32>
    %c0_174 = arith.constant 0 : index
    %c0_175 = arith.constant 0 : index
    %261 = vector.load %arg15[%c0_174, %c0_175] : memref<1x32xf32, #tpu.memory_space<vmem>>, vector<1x32xf32>
    %cst_176 = arith.constant dense<0.000000e+00> : vector<16xf32>
    %262 = vector.multi_reduction <add>, %259, %cst_176 [1] : vector<16x32xf32> to vector<16xf32>
    %263 = vector.shape_cast %262 : vector<16xf32> to vector<16x1xf32>
    %cst_177 = arith.constant 3.200000e+01 : f32
    %264 = vector.broadcast %cst_177 : f32 to vector<16x1xf32>
    %265 = arith.divf %263, %264 : vector<16x1xf32>
    %266 = vector.broadcast %265 : vector<16x1xf32> to vector<16x32xf32>
    %267 = arith.subf %259, %266 : vector<16x32xf32>
    %268 = arith.mulf %267, %267 : vector<16x32xf32>
    %cst_178 = arith.constant dense<0.000000e+00> : vector<16xf32>
    %269 = vector.multi_reduction <add>, %268, %cst_178 [1] : vector<16x32xf32> to vector<16xf32>
    %270 = vector.shape_cast %269 : vector<16xf32> to vector<16x1xf32>
    %cst_179 = arith.constant 3.200000e+01 : f32
    %271 = vector.broadcast %cst_179 : f32 to vector<16x1xf32>
    %272 = arith.divf %270, %271 : vector<16x1xf32>
    %273 = vector.broadcast %265 : vector<16x1xf32> to vector<16x32xf32>
    %274 = arith.subf %259, %273 : vector<16x32xf32>
    %cst_180 = arith.constant 9.99999974E-6 : f32
    %275 = vector.broadcast %cst_180 : f32 to vector<16x1xf32>
    %276 = arith.addf %272, %275 : vector<16x1xf32>
    %277 = math.rsqrt %276 : vector<16x1xf32>
    %278 = vector.broadcast %277 : vector<16x1xf32> to vector<16x32xf32>
    %279 = arith.mulf %274, %278 : vector<16x32xf32>
    %280 = vector.broadcast %260 : vector<1x32xf32> to vector<16x32xf32>
    %281 = arith.mulf %279, %280 : vector<16x32xf32>
    %282 = vector.broadcast %261 : vector<1x32xf32> to vector<16x32xf32>
    %283 = arith.addf %281, %282 : vector<16x32xf32>
    %c0_181 = arith.constant 0 : index
    %c0_182 = arith.constant 0 : index
    %284 = vector.load %arg16[%c0_181, %c0_182] : memref<16x32xf32, #tpu.memory_space<vmem>>, vector<16x32xf32>
    tpu.vector_store %arg16[%c0_181, %c0_182], %283 {strides = array<i32>} : memref<16x32xf32, #tpu.memory_space<vmem>>, vector<16x32xf32>,
    return
  }
}

</mosaic_0001>

<bundles_post_ra>
// kernel: conformer_encoder_pallas.1
= control target key start
LH: loop header
LB: loop body
LE: loop exit
PB: predicated region body
PF: predicated region fallthrough
CT: control target
= control target key end

     0   :  { %v2024_v0 = vmov 0.0   ;;  %vm2025_vm0 = vmmov 0   ;;  %vm88_vm1 = vcmask 261120   ;;  %vm133_vm2 = vcmask 785408   ;;  %s2027_s17 = smov 120   ;;  %s2028_s18 = smov 112   ;;  %s2553_s2 = inlined_call_operand.vmem [shape: bf16[2,32,96], index: 2, kind: input, shape index: {}]   ;;  %s2554_s0 = inlined_call_operand.vmem [shape: f32[16,32], index: 0, kind: input, shape index: {}, may-alias: {0,16}]   ;;  %s2555_s3 = inlined_call_operand.vmem [shape: f32[2,1,96], index: 3, kind: input, shape index: {}]   ;;  %s2556_s1 = inlined_call_operand.vmem [shape: f32[64,64], index: 1, kind: input, shape index: {}]   ;;  %s2557_s4 = inlined_call_operand.vmem [shape: bf16[2,32,32], index: 4, kind: input, shape index: {}]   ;;  %s2558_s5 = inlined_call_operand.vmem [shape: f32[2,1,32], index: 5, kind: input, shape index: {}]   ;;  %s2559_s8 = inlined_call_operand.vmem [shape: bf16[2,32,64], index: 8, kind: input, shape index: {}]   ;;  %s2560_s10 = inlined_call_operand.vmem [shape: bf16[2,64,32], index: 10, kind: input, shape index: {}]   ;;  %s2561_s6 = inlined_call_operand.vmem [shape: f32[2,1,32], index: 6, kind: input, shape index: {}]   ;;  %s2562_s7 = inlined_call_operand.vmem [shape: f32[2,1,32], index: 7, kind: input, shape index: {}]   ;;  %s2563_s9 = inlined_call_operand.vmem [shape: f32[2,1,64], index: 9, kind: input, shape index: {}]   ;;  %s2564_s11 = inlined_call_operand.vmem [shape: f32[2,1,32], index: 11, kind: input, shape index: {}]   ;;  %s2565_s12 = inlined_call_operand.vmem [shape: f32[2,1,32], index: 12, kind: input, shape index: {}]   ;;  %s2566_s13 = inlined_call_operand.vmem [shape: f32[2,1,32], index: 13, kind: input, shape index: {}]   ;;  %s2567_s14 = inlined_call_operand.vmem [shape: f32[1,32], index: 14, kind: input, shape index: {}]   ;;  %s2568_s15 = inlined_call_operand.vmem [shape: f32[1,32], index: 15, kind: input, shape index: {}]   ;;  %s2569_s16 = inlined_call_operand.vmem [shape: f32[16,32], index: 16, kind: output, shape index: {}, may-alias: {0,16}]  }
   0x1   :  { %2571 = sst [smem:[#allocation4_spill]] %s2553_s2  ;;  %1736 = vmatprep.subr.bf16.mxu0 %v2024_v0  ;;  %1740 = vmatprep.mubr.msk.bf16.mxu0 %vm2025_vm0, %v2024_v0  ;;  %v2131_v3 = vld [vmem:[%s2554_s0] sm:$0xff]  ;;  %v2136_v4 = vld [vmem:[%s2554_s0 + $0x8] sm:$0xff]  ;;  %vm174_vm3 = vcmask 64512   ;;  %s2026_s0 = smov 104   ;;  %v2193_v40 = vld [vmem:[%s2556_s1 + $0x18] sm:$0xff] }
   0x2   :  { %s2572_s23 = sld [smem:[#allocation4_spill]]  ;;  %v64_v5 = vpack.c.bf16 %v2136_v4, %v2131_v3  ;;  %v1586_v6 = vld [vmem:[%s2555_s3] ss:$0 sm:$0xff]  ;;  %s2029_s19 = smov 96   ;;  %v2198_v41 = vld [vmem:[%s2556_s1 + $0x8] sm:$0xff]  ;;  %vm264_vm4 = vcmask 523264  }
   0x3   :  { %v2188_v37 = vld [vmem:[%s2556_s1] sm:$0xff]  ;;  %v2204_v44 = vld [vmem:[%s2556_s1 + $0x10] sm:$0xff]  ;;  %v2220_v55 = vld [vmem:[%s2556_s1 + $0x28] sm:$0xff]  ;;  %s2031_s28 = smov 8   ;;  %s2032_s2 = smov 16   ;;  %vm456_vm5 = vcmask 130112  }
   0x4   :  { %v2214_v51 = vld [vmem:[%s2556_s1 + $0x20] sm:$0xff]  ;;  %v2227_v59 = vld [vmem:[%s2556_s1 + $0x30] sm:$0xff]  ;;  %v2232_v60 = vld [vmem:[%s2556_s1 + $0x38] sm:$0xff]  ;;  %s2030_s1 = smov 64   ;;  %s2033_s20 = smov 24   ;;  %vm467_vm6 = vcmask 195712  }
   0x5   :  { %vm478_vm7 = vcmask 261312  }
   0x8   :  { %v1920_v1 = vld [vmem:[%s2572_s23] sm:$0xff]   ;;  %v1921_v2 = vld [vmem:[%s2572_s23 + $0x8] sm:$0xff]  }
   0x9   :  { %1737 = vmatpush3.bf16.msra.mxu0 %v1920_v1 }
   0xa   :  { %1738 = vmatprep.subr.bf16.mxu0 %v2024_v0 }
   0xd   :  { %1739 = vmatpush3.bf16.msra.mxu0 %v1921_v2 }
  0x10   :  { %1741 = vmatmul.mubr.msk.bf16.vlgmr.msra.gmra.mrb[0].mxu0 %vm88_vm1, %v64_v5 }
  0xe3   :  { %v126_v7 = vpop.f32.mrb[0].mxu0 }
  0xe4   :  { %v127_v8 = vadd.f32 %v1586_v6, %v126_v7  ;;  %v1742_v9 = vpop.f32.mrb[1].mxu0 }
  0xe5   :  { %v129_v10 = vpop.f32.mrb[2].mxu0 }
  0xe6   :  { %134 = vst.msk [vmem:[#allocation2] sm:$0xff] %vm133_vm2, %v127_v8  ;;  %v130_v11 = vadd.f32 %v1586_v6, %v129_v10  ;;  %v1743_v12 = vpop.f32.mrb[3].mxu0 }
  0xe8   :  { %135 = vst.msk [vmem:[#allocation2 + $0x8] sm:$0xff] %vm133_vm2, %v130_v11 }
  0xed   :  { %v136_v13 = vld [vmem:[#allocation2] sm:$0xff] }
  0xef   :  { %v137_v14 = vld [vmem:[#allocation2 + $0x8] sm:$0xff] }
  0xf0   :  { %v1900_v15 = vpack.i.bf16 %v137_v14, %v136_v13  ;;  %v2147_v16 = vpack.c.bf16 %v137_v14, %v136_v13 }
  0xf2   :  { %1901 = vrot.lane.b32.xlu1 %v1900_v15, %s2026_s0  ;;  %1891 = vrot.lane.b32.xlu0 %v1900_v15, %s2027_s17 }
  0xf3   :  { %1752 = vmatprep.mubr.msk.bf16.mxu1 %vm174_vm3, %v2147_v16 }
  0xf6   :  { %1896 = vrot.lane.b32.xlu0 %v1900_v15, %s2028_s18  ;;  %166 = vrot.lane.b32.xlu1 %v2147_v16, %s2029_s19 }
 0x164   :  { %v1902_v17 = vpop.permute.xlu1 %1901  ;;  %v1892_v18 = vpop.permute.xlu0 %1891 }
 0x165   :  { %v1894_v19 = vunpack.i.h.bf16 %v1892_v18  ;;  %v1893_v20 = vunpack.i.l.bf16 %v1892_v18  ;;  %v1904_v21 = vunpack.i.h.bf16 %v1902_v17  ;;  %v1903_v22 = vunpack.i.l.bf16 %v1902_v17 }
 0x167   :  { %v2156_v23 = vpack.c.bf16 %v1894_v19, %v1893_v20  ;;  %v2162_v29 = vpack.c.bf16 %v1904_v21, %v1903_v22 }
 0x168   :  { %v1897_v24 = vpop.permute.xlu0 %1896  ;;  %v167_v25 = vpop.permute.xlu1 %166 }
 0x169   :  { %v1899_v26 = vunpack.i.h.bf16 %v1897_v24  ;;  %v1898_v27 = vunpack.i.l.bf16 %v1897_v24  ;;  %168 = vrot.lane.b32.xlu0 %v2156_v23, %s2029_s19  ;;  %1872 = vmatprep.subr.msk.bf16.mxu1 %vm174_vm3, %v167_v25  ;;  %v188_v28 = vsel %vm174_vm3, %v167_v25, 0 }
 0x16a   :  { %1745 = vmatpush3.bf16.xpose.msra.mxu1 %v188_v28 }
 0x16b   :  { %v2164_v30 = vpack.c.bf16 %v1899_v26, %v1898_v27 }
 0x16d   :  { %172 = vrot.lane.b32.xlu0 %v2162_v29, %s2029_s19  ;;  %170 = vrot.lane.b32.xlu1 %v2164_v30, %s2029_s19 }
 0x1db   :  { %v169_v31 = vpop.permute.xlu0 %168 }
 0x1dc   :  { %1873 = vmatprep.subr.msk.bf16.mxu1 %vm174_vm3, %v169_v31  ;;  %v191_v32 = vsel %vm174_vm3, %v169_v31, 0 }
 0x1dd   :  { %1747 = vmatpush3.bf16.xpose.msra.mxu1 %v191_v32 }
 0x1df   :  { %v171_v33 = vpop.permute.xlu1 %170  ;;  %v173_v35 = vpop.permute.xlu0 %172 }
 0x1e0   :  { %1874 = vmatprep.subr.msk.bf16.mxu1 %vm174_vm3, %v171_v33  ;;  %v194_v34 = vsel %vm174_vm3, %v171_v33, 0  ;;  %v197_v36 = vsel %vm174_vm3, %v173_v35, 0 }
 0x1e5   :  { %1749 = vmatpush3.bf16.xpose.msra.mxu1 %v194_v34 }
 0x1e6   :  { %1875 = vmatprep.subr.msk.bf16.mxu1 %vm174_vm3, %v173_v35 }
 0x1ed   :  { %1751 = vmatpush3.bf16.xpose.msra.mxu1 %v197_v36 }
 0x1ee   :  { %1792 = vmatprep.subr.bf16.mxu1 %v2024_v0 }
 0x1f4   :  { %1753 = vmatmul.mubr.msk.bf16.vlgmr.msra.gmra.mrb[0].mxu1 %vm174_vm3, %v2156_v23 }
 0x1f5   :  { %1756 = vmatprep.mubr.msk.bf16.mxu1 %vm174_vm3, %v2164_v30 }
 0x1fc   :  { %1757 = vmatmul.mubr.msk.bf16.gmra.mrb[4].mxu1 %vm174_vm3, %v2162_v29 }
 0x1fd   :  { %1800 = vmatprep.mubr.msk.bf16.mxu1 %vm2025_vm0, %v2024_v0 }
 0x2c7   :  { %v1754_v38 = vpop.f32.mrb[0].mxu1 }
 0x2c8   :  { %v233_v39 = vpop.f32.mrb[1].mxu1  ;;  %v242_v49 = vadd.f32 %v1754_v38, %v2204_v44 }
 0x2c9   :  { %v234_v42 = vadd.f32 %v233_v39, %v2188_v37  ;;  %v1755_v43 = vpop.f32.mrb[2].mxu1 }
 0x2ca   :  { %v236_v45 = vpop.f32.mrb[3].mxu1  ;;  %v245_v46 = vadd.f32 %v1755_v43, %v2193_v40  ;;  %v271_v58 = vsel %vm264_vm4, %v242_v49, -inf }
 0x2cb   :  { %v237_v47 = vadd.f32 %v236_v45, %v2198_v41  ;;  %v265_v48 = vsel %vm264_vm4, %v234_v42, -inf }
 0x2cc   :  { %266 = vmax.xlane.f32.xlu1 %v265_v48  ;;  %v274_v53 = vsel %vm264_vm4, %v245_v46, -inf }
 0x2cd   :  { %v268_v50 = vsel %vm264_vm4, %v237_v47, -inf }
 0x2ce   :  { %269 = vmax.xlane.f32.xlu0 %v268_v50 }
 0x2cf   :  { %v1758_v52 = vpop.f32.mrb[4].mxu1 }
 0x2d0   :  { %v249_v54 = vpop.f32.mrb[5].mxu1  ;;  %275 = vmax.xlane.f32.xlu1 %v274_v53  ;;  %v258_v63 = vadd.f32 %v1758_v52, %v2227_v59 }
 0x2d1   :  { %v250_v56 = vadd.f32 %v249_v54, %v2214_v51  ;;  %v1759_v57 = vpop.f32.mrb[6].mxu1 }
 0x2d2   :  { %v252_v61 = vpop.f32.mrb[7].mxu1  ;;  %272 = vmax.xlane.f32.xlu0 %v271_v58  ;;  %v261_v1 = vadd.f32 %v1759_v57, %v2232_v60  ;;  %v283_v6 = vsel %vm264_vm4, %v258_v63, -inf }
 0x2d3   :  { %v253_v62 = vadd.f32 %v252_v61, %v2220_v55  ;;  %v277_v2 = vsel %vm264_vm4, %v250_v56, -inf }
 0x2d4   :  { %v286_v7 = vsel %vm264_vm4, %v261_v1, -inf }
 0x2d5   :  { %v280_v5 = vsel %vm264_vm4, %v253_v62, -inf }
 0x2d6   :  { %278 = vmax.xlane.f32.xlu0 %v277_v2  ;;  %281 = vmax.xlane.f32.xlu1 %v280_v5 }
 0x2da   :  { %284 = vmax.xlane.f32.xlu0 %v283_v6  ;;  %287 = vmax.xlane.f32.xlu1 %v286_v7 }
 0x2eb   :  { %359 = vrot.lane.b32.xlu1 %v2156_v23, %s2030_s1 }
 0x2f0   :  { %357 = vrot.lane.b32.xlu0 %v2147_v16, %s2030_s1 }
 0x359   :  { %v267_v8 = vpop.xlane.xlu1 %266 }
 0x35a   :  { %v289_v12 = vsub.f32 %v234_v42, %v267_v8 }
 0x35b   :  { %v270_v9 = vpop.xlane.xlu0 %269 }
 0x35c   :  { %v290_v10 = vsub.f32 %v237_v47, %v270_v9  ;;  %v297_v19 = vmul.f32 1.442695, %v289_v12 }
 0x35d   :  { %v276_v11 = vpop.xlane.xlu1 %275 }
 0x35e   :  { %v292_v13 = vsub.f32 %v245_v46, %v276_v11  ;;  %v299_v14 = vmul.f32 1.442695, %v290_v10 }
 0x35f   :  { %v273_v15 = vpop.xlane.xlu0 %272 }
 0x360   :  { %v303_v17 = vmul.f32 1.442695, %v292_v13  ;;  %v291_v18 = vsub.f32 %v242_v49, %v273_v15 }
 0x362   :  { %1940 = vpow2.f32 %v303_v17  ;;  %v301_v20 = vmul.f32 1.442695, %v291_v18 }
 0x363   :  { %1942 = vpow2.f32 %v299_v14  ;;  %v279_v21 = vpop.xlane.xlu0 %278  ;;  %v282_v22 = vpop.xlane.xlu1 %281 }
 0x364   :  { %1944 = vpow2.f32 %v301_v20  ;;  %v293_v23 = vsub.f32 %v250_v56, %v279_v21  ;;  %v294_v16 = vsub.f32 %v253_v62, %v282_v22 }
 0x365   :  { %1946 = vpow2.f32 %v297_v19 }
 0x366   :  { %v305_v28 = vmul.f32 1.442695, %v293_v23  ;;  %v307_v33 = vmul.f32 1.442695, %v294_v16 }
 0x367   :  { %v285_v24 = vpop.xlane.xlu0 %284  ;;  %v288_v25 = vpop.xlane.xlu1 %287 }
 0x368   :  { %v295_v26 = vsub.f32 %v258_v63, %v285_v24  ;;  %v296_v27 = vsub.f32 %v261_v1, %v288_v25 }
 0x36a   :  { %v309_v31 = vmul.f32 1.442695, %v295_v26  ;;  %v311_v32 = vmul.f32 1.442695, %v296_v27  ;;  %v1922_v27 = vld [vmem:[%s2557_s4] sm:$0xff]  }
 0x36b   :  { %v358_v34 = vpop.permute.xlu0 %357  ;;  %v360_v38 = vpop.permute.xlu1 %359 }
 0x36c   :  { %v2245_v35 = vpop.eup %1940  ;;  %1948 = vpow2.f32 %v309_v31  ;;  %1760 = vmatprep.subr.bf16.mxu0 %v358_v34 }
 0x36d   :  { %v1943_v36 = vpop.eup %1942  ;;  %1950 = vpow2.f32 %v311_v32  ;;  %1761 = vmatpush3.bf16.msra.mxu0 %v358_v34  ;;  %v322_v39 = vsel %vm264_vm4, %v2245_v35, 0.0  ;;  %v1923_v34 = vld [vmem:[%s2557_s4 + $0x8] sm:$0xff]  }
 0x36e   :  { %v1945_v42 = vpop.eup %1944  ;;  %1952 = vpow2.f32 %v305_v28  ;;  %323 = vadd.xlane.f32.xlu1 %v322_v39  ;;  %1762 = vmatprep.subr.bf16.mxu0 %v360_v38  ;;  %v316_v46 = vsel %vm264_vm4, %v1943_v36, 0.0 }
 0x36f   :  { %1954 = vpow2.f32 %v307_v33  ;;  %v319_v43 = vsel %vm264_vm4, %v1945_v42, 0.0  ;;  %v1947_v45 = vpop.eup %1946 }
 0x370   :  { %320 = vadd.xlane.f32.xlu0 %v319_v43  ;;  %v313_v47 = vsel %vm264_vm4, %v1947_v45, 0.0 }
 0x371   :  { %1763 = vmatpush3.bf16.msra.mxu0 %v360_v38 }
 0x372   :  { %317 = vadd.xlane.f32.xlu1 %v316_v46 }
 0x374   :  { %314 = vadd.xlane.f32.xlu0 %v313_v47 }
 0x376   :  { %v1949_v48 = vpop.eup %1948 }
 0x377   :  { %v1951_v49 = vpop.eup %1950  ;;  %v331_v50 = vsel %vm264_vm4, %v1949_v48, 0.0 }
 0x378   :  { %v1953_v52 = vpop.eup %1952  ;;  %332 = vadd.xlane.f32.xlu0 %v331_v50  ;;  %v334_v53 = vsel %vm264_vm4, %v1951_v49, 0.0 }
 0x379   :  { %v1955_v54 = vpop.eup %1954  ;;  %335 = vadd.xlane.f32.xlu1 %v334_v53  ;;  %v325_v56 = vsel %vm264_vm4, %v1953_v52, 0.0  ;;  %v1598_v53 = vld [vmem:[%s2558_s5] ss:$0 sm:$0xff] }
 0x37a   :  { %v328_v57 = vsel %vm264_vm4, %v1955_v54, 0.0 }
 0x37c   :  { %326 = vadd.xlane.f32.xlu0 %v325_v56 }
 0x37d   :  { %329 = vadd.xlane.f32.xlu1 %v328_v57 }
 0x38e   :  { %361 = vrot.lane.b32.xlu1 %v2164_v30, %s2030_s1 }
 0x392   :  { %363 = vrot.lane.b32.xlu0 %v2162_v29, %s2030_s1 }
 0x3fb   :  { %v324_v58 = vpop.xlane.xlu1 %323 }
 0x3fd   :  { %v321_v61 = vpop.xlane.xlu0 %320 }
 0x3ff   :  { %v318_v62 = vpop.xlane.xlu1 %317 }
 0x400   :  { %1956 = vrcp.f32 %v318_v62 }
 0x401   :  { %v315_v63 = vpop.xlane.xlu0 %314 }
 0x402   :  { %1958 = vrcp.f32 %v315_v63 }
 0x403   :  { %1960 = vrcp.f32 %v321_v61 }
 0x404   :  { %1962 = vrcp.f32 %v324_v58 }
 0x405   :  { %v333_v1 = vpop.xlane.xlu0 %332 }
 0x406   :  { %v336_v2 = vpop.xlane.xlu1 %335  ;;  %1964 = vrcp.f32 %v333_v1 }
 0x409   :  { %v327_v5 = vpop.xlane.xlu0 %326 }
 0x40a   :  { %v1957_v6 = vpop.eup %1956  ;;  %1966 = vrcp.f32 %v327_v5  ;;  %v330_v7 = vpop.xlane.xlu1 %329 }
 0x40b   :  { %1968 = vrcp.f32 %v330_v7  ;;  %v340_v29 = vmul.f32 %v1957_v6, %v1943_v36 }
 0x40c   :  { %v1959_v30 = vpop.eup %1958  ;;  %1970 = vrcp.f32 %v336_v2 }
 0x40d   :  { %v338_v8 = vmul.f32 %v1959_v30, %v1947_v45  ;;  %v1961_v9 = vpop.eup %1960  ;;  %v364_v13 = vpop.permute.xlu0 %363 }
 0x40e   :  { %v362_v10 = vpop.permute.xlu1 %361  ;;  %v1963_v12 = vpop.eup %1962  ;;  %v342_v14 = vmul.f32 %v1961_v9, %v1945_v42 }
 0x40f   :  { %1764 = vmatprep.subr.bf16.mxu0 %v362_v10  ;;  %v353_v11 = vpack.c.bf16 %v340_v29, %v338_v8  ;;  %v344_v17 = vmul.f32 %v1963_v12, %v2245_v35 }
 0x410   :  { %1765 = vmatpush3.bf16.msra.mxu0 %v362_v10  ;;  %v1965_v15 = vpop.eup %1964 }
 0x411   :  { %1766 = vmatprep.subr.bf16.mxu0 %v364_v13  ;;  %1768 = vmatprep.mubr.msk.bf16.mxu0 %vm264_vm4, %v353_v11  ;;  %v354_v20 = vpack.c.bf16 %v344_v17, %v342_v14  ;;  %v350_v24 = vmul.f32 %v1965_v15, %v1949_v48  ;;  %v1926_v14 = vld [vmem:[%s2560_s10] sm:$0xff]   ;;  %v1927_v15 = vld [vmem:[%s2560_s10 + $0x8] sm:$0xff]  }
 0x412   :  { %1793 = vmatpush3.bf16.msra.mxu1 %v1926_v14 }
 0x413   :  { %1794 = vmatprep.subr.bf16.mxu1 %v2024_v0 }
 0x414   :  { %v1967_v18 = vpop.eup %1966  ;;  %1767 = vmatpush3.bf16.msra.mxu0 %v364_v13  ;;  %v1925_v13 = vld [vmem:[%s2559_s8 + $0x8] sm:$0xff]  }
 0x415   :  { %v1969_v19 = vpop.eup %1968  ;;  %v346_v21 = vmul.f32 %v1967_v18, %v1953_v52  ;;  %1776 = vmatprep.subr.bf16.mxu0 %v2024_v0 }
 0x416   :  { %v1971_v22 = vpop.eup %1970  ;;  %v348_v23 = vmul.f32 %v1969_v19, %v1955_v54  ;;  %1795 = vmatpush3.bf16.msra.mxu1 %v1927_v15 }
 0x417   :  { %1769 = vmatmul.mubr.msk.bf16.vlgmr.msra.gmra.mrb[4].mxu0 %vm264_vm4, %v354_v20  ;;  %v352_v25 = vmul.f32 %v1971_v22, %v1951_v49  ;;  %1796 = vmatprep.subr.bf16.mxu1 %v2024_v0 }
 0x418   :  { %v355_v16 = vpack.c.bf16 %v348_v23, %v346_v21  ;;  %1777 = vmatpush3.bf16.msra.mxu0 %v1922_v27 }
 0x419   :  { %v356_v26 = vpack.c.bf16 %v352_v25, %v350_v24  ;;  %1778 = vmatprep.subr.bf16.mxu0 %v2024_v0 }
 0x41a   :  { %1772 = vmatprep.mubr.msk.bf16.mxu0 %vm264_vm4, %v355_v16  ;;  %v1602_v16 = vld [vmem:[%s2561_s6] ss:$0 sm:$0xff] }
 0x41c   :  { %1779 = vmatpush3.bf16.msra.mxu0 %v1923_v34 }
 0x41d   :  { %1784 = vmatprep.subr.bf16.mxu0 %v2024_v0 }
 0x41f   :  { %1773 = vmatmul.mubr.msk.bf16.gmra.mrb[8].mxu0 %vm264_vm4, %v356_v26 }
 0x420   :  { %1780 = vmatprep.mubr.msk.bf16.mxu0 %vm2025_vm0, %v2024_v0 }
 0x4ea   :  { %v1770_v28 = vpop.f32.mrb[4].mxu0 }
 0x4eb   :  { %450 = vrot.lane.b32.xlu1 %v1770_v28, %s2031_s28  ;;  %v415_v31 = vpop.f32.mrb[5].mxu0  ;;  %v1603_v28 = vld [vmem:[%s2562_s7] ss:$0 sm:$0xff] }
 0x4ec   :  { %446 = vst.msk [vmem:[#allocation3] sm:$0xff] %vm174_vm3, %v415_v31  ;;  %v1771_v32 = vpop.f32.mrb[6].mxu0 }
 0x4ed   :  { %452 = vrot.lane.b32.xlu0 %v1771_v32, %s2031_s28  ;;  %v418_v33 = vpop.f32.mrb[7].mxu0 }
 0x4ee   :  { %447 = vst.msk [vmem:[#allocation3 + $0x8] sm:$0xff] %vm174_vm3, %v418_v33 }
 0x4f2   :  { %v1774_v35 = vpop.f32.mrb[8].mxu0 }
 0x4f3   :  { %v431_v36 = vpop.f32.mrb[9].mxu0 }
 0x4f4   :  { %461 = vrot.lane.b32.xlu1 %v431_v36, %s2032_s2  ;;  %v1775_v38 = vpop.f32.mrb[10].mxu0  ;;  %v1929_v36 = vld [vmem:[%s2560_s10 + $0x18] sm:$0xff]  }
 0x4f5   :  { %v434_v39 = vpop.f32.mrb[11].mxu0 }
 0x4f6   :  { %463 = vrot.lane.b32.xlu0 %v434_v39, %s2032_s2 }
 0x4f8   :  { %472 = vrot.lane.b32.xlu1 %v1774_v35, %s2033_s20  ;;  %v1928_v35 = vld [vmem:[%s2560_s10 + $0x10] sm:$0xff]  }
 0x4f9   :  { %1797 = vmatpush3.bf16.msra.mxu1 %v1928_v35 }
 0x4fa   :  { %474 = vrot.lane.b32.xlu0 %v1775_v38, %s2033_s20  ;;  %1798 = vmatprep.subr.bf16.mxu1 %v2024_v0  ;;  %v1604_v38 = vld [vmem:[%s2563_s9] ss:$0 sm:$0xff] }
 0x4fd   :  { %1799 = vmatpush3.bf16.msra.mxu1 %v1929_v36 }
 0x55d   :  { %v451_v42 = vpop.permute.xlu1 %450 }
 0x55e   :  { %457 = vst.msk [vmem:[#allocation3] sm:$0xff] %vm456_vm5, %v451_v42 }
 0x55f   :  { %v453_v43 = vpop.permute.xlu0 %452 }
 0x560   :  { %458 = vst.msk [vmem:[#allocation3 + $0x8] sm:$0xff] %vm456_vm5, %v453_v43 }
 0x566   :  { %v462_v45 = vpop.permute.xlu1 %461 }
 0x567   :  { %468 = vst.msk [vmem:[#allocation3] sm:$0xff] %vm467_vm6, %v462_v45 }
 0x568   :  { %v464_v46 = vpop.permute.xlu0 %463 }
 0x569   :  { %469 = vst.msk [vmem:[#allocation3 + $0x8] sm:$0xff] %vm467_vm6, %v464_v46 }
 0x56a   :  { %v473_v47 = vpop.permute.xlu1 %472 }
 0x56b   :  { %479 = vst.msk [vmem:[#allocation3] sm:$0xff] %vm478_vm7, %v473_v47 }
 0x56c   :  { %v475_v48 = vpop.permute.xlu0 %474 }
 0x56d   :  { %480 = vst.msk [vmem:[#allocation3 + $0x8] sm:$0xff] %vm478_vm7, %v475_v48 }
 0x572   :  { %v481_v49 = vld [vmem:[#allocation3] sm:$0xff] }
 0x574   :  { %v482_v50 = vld [vmem:[#allocation3 + $0x8] sm:$0xff] }
 0x575   :  { %v483_v52 = vpack.c.bf16 %v482_v50, %v481_v49 }
 0x577   :  { %1781 = vmatmul.mubr.msk.bf16.vlgmr.msra.gmra.mrb[12].mxu0 %vm88_vm1, %v483_v52  ;;  %v1608_v52 = vld [vmem:[%s2564_s11] ss:$0 sm:$0xff] }
 0x578   :  { %1788 = vmatprep.mubr.msk.bf16.mxu0 %vm2025_vm0, %v2024_v0 }
 0x64a   :  { %v544_v54 = vpop.f32.mrb[12].mxu0 }
 0x64b   :  { %v545_v56 = vadd.f32 %v1598_v53, %v544_v54  ;;  %v1782_v57 = vpop.f32.mrb[13].mxu0 }
 0x64c   :  { %v547_v58 = vpop.f32.mrb[14].mxu0 }
 0x64d   :  { %v548_v61 = vadd.f32 %v1598_v53, %v547_v58  ;;  %v1783_v62 = vpop.f32.mrb[15].mxu0  ;;  %v551_v63 = vadd.f32 %v545_v56, %v2131_v3 }
 0x64f   :  { %v555_v1 = vsel %vm88_vm1, %v551_v63, 0.0  ;;  %v552_v2 = vadd.f32 %v548_v61, %v2136_v4  ;;  %v1924_v4 = vld [vmem:[%s2559_s8] sm:$0xff]  }
 0x650   :  { %556 = vadd.xlane.f32.xlu1 %v555_v1  ;;  %1785 = vmatpush3.bf16.msra.mxu0 %v1924_v4  ;;  %v1931_v4 = vld [vmem:[%s2572_s23 + $0x18] sm:$0xff]  }
 0x651   :  { %v558_v5 = vsel %vm88_vm1, %v552_v2, 0.0  ;;  %1786 = vmatprep.subr.bf16.mxu0 %v2024_v0 }
 0x652   :  { %559 = vadd.xlane.f32.xlu0 %v558_v5 }
 0x654   :  { %1787 = vmatpush3.bf16.msra.mxu0 %v1925_v13 }
 0x655   :  { %1804 = vmatprep.subr.bf16.mxu0 %v2024_v0 }
 0x6dd   :  { %v557_v6 = vpop.xlane.xlu1 %556 }
 0x6de   :  { %v562_v7 = vmul.f32 0.03125, %v557_v6 }
 0x6df   :  { %v560_v30 = vpop.xlane.xlu0 %559 }
 0x6e0   :  { %v564_v8 = vsub.f32 %v551_v63, %v562_v7  ;;  %v563_v29 = vmul.f32 0.03125, %v560_v30 }
 0x6e2   :  { %v565_v9 = vsub.f32 %v552_v2, %v563_v29  ;;  %v566_v10 = vmul.f32 %v564_v8, %v564_v8 }
 0x6e4   :  { %v568_v11 = vsel %vm88_vm1, %v566_v10, 0.0  ;;  %v567_v12 = vmul.f32 %v565_v9, %v565_v9 }
 0x6e5   :  { %569 = vadd.xlane.f32.xlu0 %v568_v11 }
 0x6e6   :  { %v571_v3 = vsel %vm88_vm1, %v567_v12, 0.0 }
 0x6e7   :  { %572 = vadd.xlane.f32.xlu1 %v571_v3  ;;  %v1930_v3 = vld [vmem:[%s2572_s23 + $0x10] sm:$0xff]  }
 0x772   :  { %v570_v17 = vpop.xlane.xlu0 %569 }
 0x773   :  { %v574_v18 = vmul.f32 0.03125, %v570_v17 }
 0x774   :  { %v573_v19 = vpop.xlane.xlu1 %572 }
 0x775   :  { %v576_v20 = vadd.f32 1e-05, %v574_v18  ;;  %v575_v21 = vmul.f32 0.03125, %v573_v19 }
 0x777   :  { %1972 = vrsqrt.f32 %v576_v20  ;;  %v577_v22 = vadd.f32 1e-05, %v575_v21  ;;  %v1614_v21 = vld [vmem:[%s2565_s12] ss:$0 sm:$0xff] }
 0x779   :  { %1974 = vrsqrt.f32 %v577_v22 }
 0x781   :  { %v1973_v23 = vpop.eup %1972 }
 0x782   :  { %v580_v24 = vmul.f32 %v1973_v23, %v564_v8 }
 0x783   :  { %v1975_v25 = vpop.eup %1974 }
 0x784   :  { %v588_v26 = vmul.f32 %v1602_v16, %v580_v24  ;;  %v581_v27 = vmul.f32 %v1975_v25, %v565_v9  ;;  %v1615_v25 = vld [vmem:[%s2566_s13] ss:$0 sm:$0xff] }
 0x786   :  { %v589_v31 = vmul.f32 %v1602_v16, %v581_v27  ;;  %v596_v32 = vadd.f32 %v1603_v28, %v588_v26 }
 0x788   :  { %v597_v33 = vadd.f32 %v1603_v28, %v589_v31 }
 0x78a   :  { %v598_v34 = vpack.c.bf16 %v597_v33, %v596_v32 }
 0x78c   :  { %1789 = vmatmul.mubr.msk.bf16.vlgmr.msra.gmra.mrb[16].mxu0 %vm88_vm1, %v598_v34 }
 0x78d   :  { %1808 = vmatprep.mubr.msk.bf16.mxu0 %vm2025_vm0, %v2024_v0  ;;  %1805 = vmatpush3.bf16.msra.mxu0 %v1930_v3 }
 0x78e   :  { %1806 = vmatprep.subr.bf16.mxu0 %v2024_v0 }
 0x791   :  { %1807 = vmatpush3.bf16.msra.mxu0 %v1931_v4 }
 0x85f   :  { %v659_v39 = vpop.f32.mrb[16].mxu0 }
 0x860   :  { %v660_v42 = vadd.f32 %v1604_v38, %v659_v39  ;;  %v1790_v43 = vpop.f32.mrb[17].mxu0 }
 0x861   :  { %v662_v45 = vpop.f32.mrb[18].mxu0 }
 0x862   :  { %v663_v46 = vadd.f32 %v1604_v38, %v662_v45  ;;  %v1791_v47 = vpop.f32.mrb[19].mxu0  ;;  %v666_v48 = vmax.f32 %v660_v42, 0.0 }
 0x864   :  { %v667_v49 = vmax.f32 %v663_v46, 0.0 }
 0x866   :  { %v668_v50 = vpack.c.bf16 %v667_v49, %v666_v48 }
 0x868   :  { %1801 = vmatmul.mubr.msk.bf16.vlgmr.msra.gmra.mrb[8].mxu1 %vm264_vm4, %v668_v50 }
 0x93b   :  { %v745_v53 = vpop.f32.mrb[8].mxu1 }
 0x93c   :  { %v746_v54 = vadd.f32 %v1608_v52, %v745_v53  ;;  %v1802_v56 = vpop.f32.mrb[9].mxu1 }
 0x93d   :  { %v748_v57 = vpop.f32.mrb[10].mxu1 }
 0x93e   :  { %v749_v58 = vadd.f32 %v1608_v52, %v748_v57  ;;  %v1803_v61 = vpop.f32.mrb[11].mxu1  ;;  %v752_v62 = vadd.f32 %v746_v54, %v596_v32  ;;  %v1621_v32 = vld [vmem:[%s2555_s3 + $0x1] ss:$0 sm:$0xff] }
 0x940   :  { %v756_v63 = vsel %vm88_vm1, %v752_v62, 0.0  ;;  %v753_v1 = vadd.f32 %v749_v58, %v597_v33 }
 0x941   :  { %757 = vadd.xlane.f32.xlu0 %v756_v63 }
 0x942   :  { %v759_v2 = vsel %vm88_vm1, %v753_v1, 0.0 }
 0x943   :  { %760 = vadd.xlane.f32.xlu1 %v759_v2 }
 0x9ce   :  { %v758_v5 = vpop.xlane.xlu0 %757 }
 0x9cf   :  { %v762_v6 = vmul.f32 0.03125, %v758_v5 }
 0x9d0   :  { %v761_v7 = vpop.xlane.xlu1 %760 }
 0x9d1   :  { %v764_v30 = vsub.f32 %v752_v62, %v762_v6  ;;  %v763_v8 = vmul.f32 0.03125, %v761_v7 }
 0x9d3   :  { %v765_v29 = vsub.f32 %v753_v1, %v763_v8  ;;  %v766_v9 = vmul.f32 %v764_v30, %v764_v30 }
 0x9d5   :  { %v768_v10 = vsel %vm88_vm1, %v766_v9, 0.0  ;;  %v767_v11 = vmul.f32 %v765_v29, %v765_v29 }
 0x9d6   :  { %769 = vadd.xlane.f32.xlu0 %v768_v10 }
 0x9d7   :  { %v771_v12 = vsel %vm88_vm1, %v767_v11, 0.0 }
 0x9d8   :  { %772 = vadd.xlane.f32.xlu1 %v771_v12 }
 0xa63   :  { %v770_v13 = vpop.xlane.xlu0 %769 }
 0xa64   :  { %v774_v14 = vmul.f32 0.03125, %v770_v13 }
 0xa65   :  { %v773_v15 = vpop.xlane.xlu1 %772 }
 0xa66   :  { %v776_v17 = vadd.f32 1e-05, %v774_v14  ;;  %v775_v18 = vmul.f32 0.03125, %v773_v15 }
 0xa68   :  { %1976 = vrsqrt.f32 %v776_v17  ;;  %v777_v19 = vadd.f32 1e-05, %v775_v18 }
 0xa6a   :  { %1978 = vrsqrt.f32 %v777_v19 }
 0xa72   :  { %v1977_v20 = vpop.eup %1976 }
 0xa73   :  { %v780_v22 = vmul.f32 %v1977_v20, %v764_v30 }
 0xa74   :  { %v1979_v23 = vpop.eup %1978 }
 0xa75   :  { %v788_v16 = vmul.f32 %v1614_v21, %v780_v22  ;;  %v781_v24 = vmul.f32 %v1979_v23, %v765_v29 }
 0xa77   :  { %v789_v26 = vmul.f32 %v1614_v21, %v781_v24  ;;  %v2358_v27 = vadd.f32 %v1615_v25, %v788_v16 }
 0xa79   :  { %v2360_v28 = vadd.f32 %v1615_v25, %v789_v26 }
 0xa7b   :  { %v798_v31 = vpack.c.bf16 %v2360_v28, %v2358_v27 }
 0xa7d   :  { %1809 = vmatmul.mubr.msk.bf16.vlgmr.msra.gmra.mrb[20].mxu0 %vm88_vm1, %v798_v31 }
 0xb50   :  { %v861_v33 = vpop.f32.mrb[20].mxu0 }
 0xb51   :  { %v862_v34 = vadd.f32 %v1621_v32, %v861_v33  ;;  %v1810_v35 = vpop.f32.mrb[21].mxu0 }
 0xb52   :  { %v864_v36 = vpop.f32.mrb[22].mxu0 }
 0xb53   :  { %868 = vst.msk [vmem:[#allocation2] sm:$0xff] %vm133_vm2, %v862_v34  ;;  %v865_v38 = vadd.f32 %v1621_v32, %v864_v36  ;;  %v1811_v39 = vpop.f32.mrb[23].mxu0 }
 0xb55   :  { %869 = vst.msk [vmem:[#allocation2 + $0x8] sm:$0xff] %vm133_vm2, %v865_v38 }
 0xb5a   :  { %v870_v42 = vld [vmem:[#allocation2] sm:$0xff] }
 0xb5c   :  { %v871_v43 = vld [vmem:[#allocation2 + $0x8] sm:$0xff] }
 0xb5d   :  { %v1910_v45 = vpack.i.bf16 %v871_v43, %v870_v42  ;;  %v2370_v46 = vpack.c.bf16 %v871_v43, %v870_v42 }
 0xb5f   :  { %1911 = vrot.lane.b32.xlu1 %v1910_v45, %s2028_s18  ;;  %1906 = vrot.lane.b32.xlu0 %v1910_v45, %s2027_s17 }
 0xb60   :  { %1820 = vmatprep.mubr.msk.bf16.mxu1 %vm174_vm3, %v2370_v46 }
 0xb63   :  { %1916 = vrot.lane.b32.xlu1 %v1910_v45, %s2026_s0  ;;  %900 = vrot.lane.b32.xlu0 %v2370_v46, %s2029_s19 }
 0xbd1   :  { %v1912_v47 = vpop.permute.xlu1 %1911  ;;  %v1907_v48 = vpop.permute.xlu0 %1906 }
 0xbd2   :  { %v1914_v49 = vunpack.i.h.bf16 %v1912_v47  ;;  %v1913_v50 = vunpack.i.l.bf16 %v1912_v47  ;;  %v1909_v52 = vunpack.i.h.bf16 %v1907_v48  ;;  %v1908_v53 = vunpack.i.l.bf16 %v1907_v48 }
 0xbd4   :  { %v2379_v54 = vpack.c.bf16 %v1914_v49, %v1913_v50  ;;  %v2381_v56 = vpack.c.bf16 %v1909_v52, %v1908_v53 }
 0xbd5   :  { %v1917_v57 = vpop.permute.xlu1 %1916  ;;  %v901_v58 = vpop.permute.xlu0 %900 }
 0xbd6   :  { %v1919_v61 = vunpack.i.h.bf16 %v1917_v57  ;;  %v1918_v62 = vunpack.i.l.bf16 %v1917_v57  ;;  %v921_v63 = vsel %vm174_vm3, %v901_v58, 0  ;;  %902 = vrot.lane.b32.xlu1 %v2381_v56, %s2029_s19  ;;  %904 = vrot.lane.b32.xlu0 %v2379_v54, %s2029_s19 }
 0xbd7   :  { %1876 = vmatprep.subr.msk.bf16.mxu1 %vm174_vm3, %v901_v58 }
 0xbd8   :  { %v2389_v1 = vpack.c.bf16 %v1919_v61, %v1918_v62  ;;  %1813 = vmatpush3.bf16.xpose.msra.mxu1 %v921_v63 }
 0xbda   :  { %906 = vrot.lane.b32.xlu1 %v2389_v1, %s2029_s19 }
 0xc48   :  { %v903_v2 = vpop.permute.xlu1 %902  ;;  %v905_v6 = vpop.permute.xlu0 %904 }
 0xc49   :  { %v924_v5 = vsel %vm174_vm3, %v903_v2, 0  ;;  %1877 = vmatprep.subr.msk.bf16.mxu1 %vm174_vm3, %v903_v2  ;;  %v927_v7 = vsel %vm174_vm3, %v905_v6, 0 }
 0xc4a   :  { %1815 = vmatpush3.bf16.xpose.msra.mxu1 %v924_v5 }
 0xc4b   :  { %1878 = vmatprep.subr.msk.bf16.mxu1 %vm174_vm3, %v905_v6 }
 0xc4c   :  { %v907_v30 = vpop.permute.xlu1 %906 }
 0xc4d   :  { %v930_v8 = vsel %vm174_vm3, %v907_v30, 0 }
 0xc52   :  { %1817 = vmatpush3.bf16.xpose.msra.mxu1 %v927_v7 }
 0xc53   :  { %1879 = vmatprep.subr.msk.bf16.mxu1 %vm174_vm3, %v907_v30 }
 0xc5a   :  { %1819 = vmatpush3.bf16.xpose.msra.mxu1 %v930_v8 }
 0xc5b   :  { %1860 = vmatprep.subr.bf16.mxu1 %v2024_v0 }
 0xc61   :  { %1821 = vmatmul.mubr.msk.bf16.vlgmr.msra.gmra.mrb[12].mxu1 %vm174_vm3, %v2381_v56 }
 0xc62   :  { %1824 = vmatprep.mubr.msk.bf16.mxu1 %vm174_vm3, %v2379_v54 }
 0xc69   :  { %1825 = vmatmul.mubr.msk.bf16.gmra.mrb[16].mxu1 %vm174_vm3, %v2389_v1 }
 0xc6a   :  { %1868 = vmatprep.mubr.msk.bf16.mxu1 %vm2025_vm0, %v2024_v0 }
 0xd34   :  { %v1822_v29 = vpop.f32.mrb[12].mxu1 }
 0xd35   :  { %v966_v9 = vpop.f32.mrb[13].mxu1  ;;  %v975_v3 = vadd.f32 %v1822_v29, %v2204_v44 }
 0xd36   :  { %v967_v10 = vadd.f32 %v966_v9, %v2188_v37  ;;  %v1823_v11 = vpop.f32.mrb[14].mxu1 }
 0xd37   :  { %v969_v12 = vpop.f32.mrb[15].mxu1  ;;  %v978_v15 = vadd.f32 %v1823_v11, %v2193_v40  ;;  %v1003_v18 = vsel %vm264_vm4, %v975_v3, -inf }
 0xd38   :  { %v970_v4 = vadd.f32 %v969_v12, %v2198_v41  ;;  %v997_v13 = vsel %vm264_vm4, %v967_v10, -inf }
 0xd39   :  { %998 = vmax.xlane.f32.xlu0 %v997_v13  ;;  %v1006_v23 = vsel %vm264_vm4, %v978_v15, -inf }
 0xd3a   :  { %v1000_v14 = vsel %vm264_vm4, %v970_v4, -inf }
 0xd3b   :  { %1001 = vmax.xlane.f32.xlu1 %v1000_v14 }
 0xd3c   :  { %v1826_v17 = vpop.f32.mrb[16].mxu1 }
 0xd3d   :  { %v982_v19 = vpop.f32.mrb[17].mxu1  ;;  %1004 = vmax.xlane.f32.xlu0 %v1003_v18  ;;  %v991_v44 = vadd.f32 %v1826_v17, %v2227_v59 }
 0xd3e   :  { %v983_v37 = vadd.f32 %v982_v19, %v2214_v51  ;;  %v1827_v20 = vpop.f32.mrb[18].mxu1 }
 0xd3f   :  { %v985_v21 = vpop.f32.mrb[19].mxu1  ;;  %v994_v40 = vadd.f32 %v1827_v20, %v2232_v60  ;;  %v1015_v16 = vsel %vm264_vm4, %v991_v44, -inf }
 0xd40   :  { %v986_v41 = vadd.f32 %v985_v21, %v2220_v55  ;;  %v1009_v22 = vsel %vm264_vm4, %v983_v37, -inf }
 0xd41   :  { %1010 = vmax.xlane.f32.xlu1 %v1009_v22  ;;  %1007 = vmax.xlane.f32.xlu0 %v1006_v23  ;;  %v1018_v51 = vsel %vm264_vm4, %v994_v40, -inf }
 0xd42   :  { %v1012_v24 = vsel %vm264_vm4, %v986_v41, -inf }
 0xd45   :  { %1016 = vmax.xlane.f32.xlu1 %v1015_v16  ;;  %1013 = vmax.xlane.f32.xlu0 %v1012_v24 }
 0xd49   :  { %1019 = vmax.xlane.f32.xlu0 %v1018_v51 }
 0xd56   :  { %1089 = vrot.lane.b32.xlu1 %v2370_v46, %s2030_s1 }
 0xdc6   :  { %v999_v55 = vpop.xlane.xlu0 %998 }
 0xdc7   :  { %v1021_v59 = vsub.f32 %v967_v10, %v999_v55 }
 0xdc8   :  { %v1002_v25 = vpop.xlane.xlu1 %1001 }
 0xdc9   :  { %v1029_v32 = vmul.f32 1.442695, %v1021_v59  ;;  %v1022_v60 = vsub.f32 %v970_v4, %v1002_v25 }
 0xdca   :  { %v1005_v26 = vpop.xlane.xlu0 %1004 }
 0xdcb   :  { %v1023_v31 = vsub.f32 %v975_v3, %v1005_v26  ;;  %v1031_v42 = vmul.f32 1.442695, %v1022_v60 }
 0xdcd   :  { %v1033_v33 = vmul.f32 1.442695, %v1023_v31 }
 0xdce   :  { %v1011_v34 = vpop.xlane.xlu1 %1010  ;;  %v1008_v35 = vpop.xlane.xlu0 %1007 }
 0xdcf   :  { %1980 = vpow2.f32 %v1033_v33  ;;  %v1024_v36 = vsub.f32 %v978_v15, %v1008_v35  ;;  %v1025_v38 = vsub.f32 %v983_v37, %v1011_v34 }
 0xdd0   :  { %1982 = vpow2.f32 %v1029_v32 }
 0xdd1   :  { %v1035_v39 = vmul.f32 1.442695, %v1024_v36  ;;  %v1037_v46 = vmul.f32 1.442695, %v1025_v38  ;;  %v1932_v38 = vld [vmem:[%s2557_s4 + $0x10] sm:$0xff]  }
 0xdd2   :  { %v1017_v43 = vpop.xlane.xlu1 %1016  ;;  %v1014_v45 = vpop.xlane.xlu0 %1013 }
 0xdd3   :  { %v1027_v47 = vsub.f32 %v991_v44, %v1017_v43  ;;  %1984 = vpow2.f32 %v1035_v39  ;;  %v1026_v49 = vsub.f32 %v986_v41, %v1014_v45 }
 0xdd4   :  { %1986 = vpow2.f32 %v1031_v42 }
 0xdd5   :  { %v1041_v48 = vmul.f32 1.442695, %v1027_v47  ;;  %v1039_v61 = vmul.f32 1.442695, %v1026_v49  ;;  %v1933_v47 = vld [vmem:[%s2557_s4 + $0x18] sm:$0xff]  }
 0xdd6   :  { %v1090_v50 = vpop.permute.xlu1 %1089  ;;  %v1020_v52 = vpop.xlane.xlu0 %1019 }
 0xdd7   :  { %1988 = vpow2.f32 %v1041_v48  ;;  %v1028_v53 = vsub.f32 %v994_v40, %v1020_v52  ;;  %1828 = vmatprep.subr.bf16.mxu0 %v1090_v50 }
 0xdd8   :  { %1829 = vmatpush3.bf16.msra.mxu0 %v1090_v50  ;;  %1990 = vpow2.f32 %v1037_v46 }
 0xdd9   :  { %v2426_v57 = vpop.eup %1980  ;;  %v1043_v58 = vmul.f32 1.442695, %v1028_v53 }
 0xdda   :  { %v1051_v62 = vsel %vm264_vm4, %v2426_v57, 0.0  ;;  %v1983_v63 = vpop.eup %1982 }
 0xddb   :  { %1992 = vpow2.f32 %v1043_v58  ;;  %1052 = vadd.xlane.f32.xlu1 %v1051_v62  ;;  %v1045_v5 = vsel %vm264_vm4, %v1983_v63, 0.0 }
 0xddc   :  { %1994 = vpow2.f32 %v1039_v61 }
 0xddd   :  { %v1985_v2 = vpop.eup %1984 }
 0xdde   :  { %v1054_v6 = vsel %vm264_vm4, %v1985_v2, 0.0  ;;  %v1987_v7 = vpop.eup %1986 }
 0xddf   :  { %1046 = vadd.xlane.f32.xlu1 %v1045_v5  ;;  %1055 = vadd.xlane.f32.xlu0 %v1054_v6  ;;  %v1048_v9 = vsel %vm264_vm4, %v1987_v7, 0.0  ;;  %v1638_v6 = vld [vmem:[%s2558_s5 + $0x1] ss:$0 sm:$0xff] }
 0xde1   :  { %v2432_v30 = vpop.eup %1988 }
 0xde2   :  { %v1063_v8 = vsel %vm264_vm4, %v2432_v30, 0.0  ;;  %v1991_v29 = vpop.eup %1990 }
 0xde3   :  { %1064 = vadd.xlane.f32.xlu1 %v1063_v8  ;;  %1049 = vadd.xlane.f32.xlu0 %v1048_v9  ;;  %v1057_v11 = vsel %vm264_vm4, %v1991_v29, 0.0 }
 0xde5   :  { %v1993_v10 = vpop.eup %1992 }
 0xde6   :  { %v1066_v12 = vsel %vm264_vm4, %v1993_v10, 0.0  ;;  %v1995_v3 = vpop.eup %1994 }
 0xde7   :  { %1058 = vadd.xlane.f32.xlu1 %v1057_v11  ;;  %1067 = vadd.xlane.f32.xlu0 %v1066_v12  ;;  %v1060_v4 = vsel %vm264_vm4, %v1995_v3, 0.0 }
 0xdeb   :  { %1061 = vadd.xlane.f32.xlu0 %v1060_v4 }
 0xdf8   :  { %1093 = vrot.lane.b32.xlu1 %v2379_v54, %s2030_s1 }
 0xdfc   :  { %1095 = vrot.lane.b32.xlu1 %v2389_v1, %s2030_s1 }
 0xe01   :  { %1091 = vrot.lane.b32.xlu0 %v2381_v56, %s2030_s1 }
 0xe68   :  { %v1053_v13 = vpop.xlane.xlu1 %1052 }
 0xe6c   :  { %v1047_v14 = vpop.xlane.xlu1 %1046  ;;  %v1056_v15 = vpop.xlane.xlu0 %1055 }
 0xe6d   :  { %1996 = vrcp.f32 %v1047_v14 }
 0xe70   :  { %v1065_v17 = vpop.xlane.xlu1 %1064  ;;  %v1050_v18 = vpop.xlane.xlu0 %1049 }
 0xe71   :  { %1998 = vrcp.f32 %v1050_v18 }
 0xe72   :  { %2000 = vrcp.f32 %v1056_v15 }
 0xe73   :  { %2002 = vrcp.f32 %v1053_v13 }
 0xe74   :  { %v1068_v19 = vpop.xlane.xlu0 %1067  ;;  %v1059_v37 = vpop.xlane.xlu1 %1058 }
 0xe75   :  { %2004 = vrcp.f32 %v1059_v37 }
 0xe77   :  { %v1997_v54 = vpop.eup %1996 }
 0xe78   :  { %v1062_v20 = vpop.xlane.xlu0 %1061  ;;  %v1094_v1 = vpop.permute.xlu1 %1093  ;;  %v1070_v41 = vmul.f32 %v1997_v54, %v1983_v63 }
 0xe79   :  { %2006 = vrcp.f32 %v1062_v20 }
 0xe7a   :  { %2008 = vrcp.f32 %v1068_v19 }
 0xe7b   :  { %v1999_v21 = vpop.eup %1998  ;;  %2010 = vrcp.f32 %v1065_v17 }
 0xe7c   :  { %v1092_v44 = vpop.permute.xlu0 %1091  ;;  %v1072_v56 = vmul.f32 %v1999_v21, %v1987_v7  ;;  %v2001_v23 = vpop.eup %2000  ;;  %v1935_v21 = vld [vmem:[%s2559_s8 + $0x18] sm:$0xff]  }
 0xe7d   :  { %1830 = vmatprep.subr.bf16.mxu0 %v1092_v44  ;;  %v2003_v40 = vpop.eup %2002  ;;  %v1096_v24 = vpop.permute.xlu1 %1095  ;;  %v1076_v55 = vmul.f32 %v2001_v23, %v1985_v2 }
 0xe7e   :  { %1831 = vmatpush3.bf16.msra.mxu0 %v1092_v44  ;;  %v1085_v22 = vpack.c.bf16 %v1072_v56, %v1070_v41  ;;  %v1074_v25 = vmul.f32 %v2003_v40, %v2426_v57  ;;  %v1937_v44 = vld [vmem:[%s2560_s10 + $0x28] sm:$0xff]  }
 0xe7f   :  { %1832 = vmatprep.subr.bf16.mxu0 %v1094_v1  ;;  %v2005_v16 = vpop.eup %2004 }
 0xe80   :  { %1836 = vmatprep.mubr.msk.bf16.mxu0 %vm264_vm4, %v1085_v22  ;;  %v1078_v26 = vmul.f32 %v2005_v16, %v1991_v29  ;;  %v1086_v31 = vpack.c.bf16 %v1076_v55, %v1074_v25  ;;  %v1644_v55 = vld [vmem:[%s2561_s6 + $0x1] ss:$0 sm:$0xff] }
 0xe82   :  { %1833 = vmatpush3.bf16.msra.mxu0 %v1094_v1  ;;  %v1936_v1 = vld [vmem:[%s2560_s10 + $0x20] sm:$0xff]  }
 0xe83   :  { %v2007_v51 = vpop.eup %2006  ;;  %1834 = vmatprep.subr.bf16.mxu0 %v1096_v24  ;;  %1861 = vmatpush3.bf16.msra.mxu1 %v1936_v1 }
 0xe84   :  { %v1080_v59 = vmul.f32 %v2007_v51, %v1995_v3  ;;  %v2009_v32 = vpop.eup %2008  ;;  %1862 = vmatprep.subr.bf16.mxu1 %v2024_v0 }
 0xe85   :  { %v2011_v60 = vpop.eup %2010  ;;  %v1084_v34 = vmul.f32 %v2009_v32, %v1993_v10 }
 0xe86   :  { %1835 = vmatpush3.bf16.msra.mxu0 %v1096_v24  ;;  %v1087_v33 = vpack.c.bf16 %v1080_v59, %v1078_v26  ;;  %v1082_v35 = vmul.f32 %v2011_v60, %v2432_v30 }
 0xe87   :  { %1844 = vmatprep.subr.bf16.mxu0 %v2024_v0  ;;  %1863 = vmatpush3.bf16.msra.mxu1 %v1937_v44 }
 0xe88   :  { %v1088_v36 = vpack.c.bf16 %v1084_v34, %v1082_v35  ;;  %1864 = vmatprep.subr.bf16.mxu1 %v2024_v0  ;;  %v1938_v35 = vld [vmem:[%s2560_s10 + $0x30] sm:$0xff]  }
 0xe89   :  { %1837 = vmatmul.mubr.msk.bf16.vlgmr.msra.gmra.mrb[24].mxu0 %vm264_vm4, %v1086_v31  ;;  %v1645_v31 = vld [vmem:[%s2562_s7 + $0x1] ss:$0 sm:$0xff] }
 0xe8a   :  { %1840 = vmatprep.mubr.msk.bf16.mxu0 %vm264_vm4, %v1087_v33  ;;  %1845 = vmatpush3.bf16.msra.mxu0 %v1932_v38  ;;  %v1651_v38 = vld [vmem:[%s2563_s9 + $0x1] ss:$0 sm:$0xff] }
 0xe8b   :  { %1846 = vmatprep.subr.bf16.mxu0 %v2024_v0  ;;  %1865 = vmatpush3.bf16.msra.mxu1 %v1938_v35 }
 0xe8c   :  { %1866 = vmatprep.subr.bf16.mxu1 %v2024_v0 }
 0xe8e   :  { %1847 = vmatpush3.bf16.msra.mxu0 %v1933_v47 }
 0xe8f   :  { %1852 = vmatprep.subr.bf16.mxu0 %v2024_v0 }
 0xe91   :  { %1841 = vmatmul.mubr.msk.bf16.gmra.mrb[28].mxu0 %vm264_vm4, %v1088_v36  ;;  %v1939_v36 = vld [vmem:[%s2560_s10 + $0x38] sm:$0xff]  }
 0xe92   :  { %1848 = vmatprep.mubr.msk.bf16.mxu0 %vm2025_vm0, %v2024_v0  ;;  %1867 = vmatpush3.bf16.msra.mxu1 %v1939_v36 }
 0xf5c   :  { %v1838_v39 = vpop.f32.mrb[24].mxu0 }
 0xf5d   :  { %1182 = vrot.lane.b32.xlu0 %v1838_v39, %s2031_s28  ;;  %v1147_v42 = vpop.f32.mrb[25].mxu0 }
 0xf5e   :  { %1178 = vst.msk [vmem:[#allocation3] sm:$0xff] %vm174_vm3, %v1147_v42  ;;  %v1839_v43 = vpop.f32.mrb[26].mxu0 }
 0xf5f   :  { %1184 = vrot.lane.b32.xlu1 %v1839_v43, %s2031_s28  ;;  %v1150_v45 = vpop.f32.mrb[27].mxu0 }
 0xf60   :  { %1179 = vst.msk [vmem:[#allocation3 + $0x8] sm:$0xff] %vm174_vm3, %v1150_v45 }
 0xf64   :  { %v1842_v46 = vpop.f32.mrb[28].mxu0 }
 0xf65   :  { %v1163_v48 = vpop.f32.mrb[29].mxu0 }
 0xf66   :  { %1192 = vrot.lane.b32.xlu0 %v1163_v48, %s2032_s2  ;;  %v1843_v49 = vpop.f32.mrb[30].mxu0 }
 0xf67   :  { %v1166_v50 = vpop.f32.mrb[31].mxu0 }
 0xf68   :  { %1194 = vrot.lane.b32.xlu1 %v1166_v50, %s2032_s2 }
 0xf6a   :  { %1202 = vrot.lane.b32.xlu0 %v1842_v46, %s2033_s20 }
 0xf6c   :  { %1204 = vrot.lane.b32.xlu1 %v1843_v49, %s2033_s20 }
 0xfcf   :  { %v1183_v52 = vpop.permute.xlu0 %1182 }
 0xfd0   :  { %1188 = vst.msk [vmem:[#allocation3] sm:$0xff] %vm456_vm5, %v1183_v52 }
 0xfd1   :  { %v1185_v53 = vpop.permute.xlu1 %1184 }
 0xfd2   :  { %1189 = vst.msk [vmem:[#allocation3 + $0x8] sm:$0xff] %vm456_vm5, %v1185_v53 }
 0xfd8   :  { %v1193_v57 = vpop.permute.xlu0 %1192 }
 0xfd9   :  { %1198 = vst.msk [vmem:[#allocation3] sm:$0xff] %vm467_vm6, %v1193_v57 }
 0xfda   :  { %v1195_v58 = vpop.permute.xlu1 %1194 }
 0xfdb   :  { %1199 = vst.msk [vmem:[#allocation3 + $0x8] sm:$0xff] %vm467_vm6, %v1195_v58 }
 0xfdc   :  { %v1203_v61 = vpop.permute.xlu0 %1202 }
 0xfdd   :  { %1208 = vst.msk [vmem:[#allocation3] sm:$0xff] %vm478_vm7, %v1203_v61 }
 0xfde   :  { %v1205_v62 = vpop.permute.xlu1 %1204 }
 0xfdf   :  { %1209 = vst.msk [vmem:[#allocation3 + $0x8] sm:$0xff] %vm478_vm7, %v1205_v62 }
 0xfe4   :  { %v1210_v63 = vld [vmem:[#allocation3] sm:$0xff] }
 0xfe6   :  { %v1211_v2 = vld [vmem:[#allocation3 + $0x8] sm:$0xff] }
 0xfe7   :  { %v1212_v5 = vpack.c.bf16 %v1211_v2, %v1210_v63 }
 0xfe9   :  { %1849 = vmatmul.mubr.msk.bf16.vlgmr.msra.gmra.mrb[32].mxu0 %vm88_vm1, %v1212_v5 }
 0xfea   :  { %1856 = vmatprep.mubr.msk.bf16.mxu0 %vm2025_vm0, %v2024_v0 }
0x10bc   :  { %v1275_v7 = vpop.f32.mrb[32].mxu0 }
0x10bd   :  { %v1276_v30 = vadd.f32 %v1638_v6, %v1275_v7  ;;  %v1850_v8 = vpop.f32.mrb[33].mxu0 }
0x10be   :  { %v1278_v29 = vpop.f32.mrb[34].mxu0 }
0x10bf   :  { %v1279_v9 = vadd.f32 %v1638_v6, %v1278_v29  ;;  %v1851_v10 = vpop.f32.mrb[35].mxu0  ;;  %v1282_v11 = vadd.f32 %v1276_v30, %v2358_v27 }
0x10c1   :  { %v1288_v12 = vsel %vm88_vm1, %v1282_v11, 0.0  ;;  %v1283_v3 = vadd.f32 %v1279_v9, %v2360_v28  ;;  %v1934_v28 = vld [vmem:[%s2559_s8 + $0x10] sm:$0xff]  }
0x10c2   :  { %1289 = vadd.xlane.f32.xlu0 %v1288_v12  ;;  %1853 = vmatpush3.bf16.msra.mxu0 %v1934_v28  ;;  %v1673_v28 = vld [vmem:[%s2566_s13 + $0x1] ss:$0 sm:$0xff] }
0x10c3   :  { %v1291_v4 = vsel %vm88_vm1, %v1283_v3, 0.0  ;;  %1854 = vmatprep.subr.bf16.mxu0 %v2024_v0  ;;  %v1664_v0 = vld [vmem:[%s2564_s11 + $0x1] ss:$0 sm:$0xff] }
0x10c4   :  { %1292 = vadd.xlane.f32.xlu1 %v1291_v4 }
0x10c6   :  { %1855 = vmatpush3.bf16.msra.mxu0 %v1935_v21 }
0x114f   :  { %v1290_v13 = vpop.xlane.xlu0 %1289 }
0x1150   :  { %v1294_v14 = vmul.f32 0.03125, %v1290_v13 }
0x1151   :  { %v1293_v15 = vpop.xlane.xlu1 %1292 }
0x1152   :  { %v1296_v17 = vsub.f32 %v1282_v11, %v1294_v14  ;;  %v1295_v18 = vmul.f32 0.03125, %v1293_v15 }
0x1154   :  { %v1297_v19 = vsub.f32 %v1283_v3, %v1295_v18  ;;  %v1298_v37 = vmul.f32 %v1296_v17, %v1296_v17 }
0x1156   :  { %v1300_v20 = vsel %vm88_vm1, %v1298_v37, 0.0  ;;  %v1299_v54 = vmul.f32 %v1297_v19, %v1297_v19 }
0x1157   :  { %1301 = vadd.xlane.f32.xlu0 %v1300_v20  ;;  %v1672_v20 = vld [vmem:[%s2565_s12 + $0x1] ss:$0 sm:$0xff] }
0x1158   :  { %v1303_v27 = vsel %vm88_vm1, %v1299_v54, 0.0 }
0x115b   :  { %1304 = vadd.xlane.f32.xlu0 %v1303_v27 }
0x11e4   :  { %v1302_v41 = vpop.xlane.xlu0 %1301 }
0x11e5   :  { %v1306_v56 = vmul.f32 0.03125, %v1302_v41 }
0x11e7   :  { %v1308_v22 = vadd.f32 1e-05, %v1306_v56 }
0x11e8   :  { %v1305_v23 = vpop.xlane.xlu0 %1304 }
0x11e9   :  { %2012 = vrsqrt.f32 %v1308_v22  ;;  %v1307_v40 = vmul.f32 0.03125, %v1305_v23 }
0x11eb   :  { %v1309_v16 = vadd.f32 1e-05, %v1307_v40 }
0x11ed   :  { %2014 = vrsqrt.f32 %v1309_v16 }
0x11f3   :  { %v2013_v24 = vpop.eup %2012 }
0x11f4   :  { %v1312_v51 = vmul.f32 %v2013_v24, %v1296_v17 }
0x11f6   :  { %v1320_v25 = vmul.f32 %v1644_v55, %v1312_v51 }
0x11f7   :  { %v2015_v59 = vpop.eup %2014 }
0x11f8   :  { %v1313_v26 = vmul.f32 %v2015_v59, %v1297_v19  ;;  %v1328_v33 = vadd.f32 %v1645_v31, %v1320_v25 }
0x11fa   :  { %v1321_v32 = vmul.f32 %v1644_v55, %v1313_v26 }
0x11fc   :  { %v1329_v60 = vadd.f32 %v1645_v31, %v1321_v32 }
0x11fe   :  { %v1330_v34 = vpack.c.bf16 %v1329_v60, %v1328_v33 }
0x1200   :  { %1857 = vmatmul.mubr.msk.bf16.vlgmr.msra.gmra.mrb[36].mxu0 %vm88_vm1, %v1330_v34 }
0x12d3   :  { %v1393_v39 = vpop.f32.mrb[36].mxu0 }
0x12d4   :  { %v1394_v42 = vadd.f32 %v1651_v38, %v1393_v39  ;;  %v1858_v43 = vpop.f32.mrb[37].mxu0 }
0x12d5   :  { %v1396_v45 = vpop.f32.mrb[38].mxu0 }
0x12d6   :  { %v1397_v47 = vadd.f32 %v1651_v38, %v1396_v45  ;;  %v1859_v46 = vpop.f32.mrb[39].mxu0  ;;  %v1400_v48 = vmax.f32 %v1394_v42, 0.0  ;;  %v1674_v42 = vld [vmem:[%s2567_s14] ss:$0 sm:$0xff] }
0x12d8   :  { %v1401_v49 = vmax.f32 %v1397_v47, 0.0  ;;  %v1675_v47 = vld [vmem:[%s2568_s15] ss:$0 sm:$0xff] }
0x12da   :  { %v1402_v50 = vpack.c.bf16 %v1401_v49, %v1400_v48 }
0x12dc   :  { %1869 = vmatmul.mubr.msk.bf16.vlgmr.msra.gmra.mrb[20].mxu1 %vm264_vm4, %v1402_v50 }
0x13af   :  { %v1481_v52 = vpop.f32.mrb[20].mxu1 }
0x13b0   :  { %v1482_v53 = vadd.f32 %v1664_v0, %v1481_v52  ;;  %v1870_v57 = vpop.f32.mrb[21].mxu1 }
0x13b1   :  { %v1484_v58 = vpop.f32.mrb[22].mxu1 }
0x13b2   :  { %v1485_v61 = vadd.f32 %v1664_v0, %v1484_v58  ;;  %v1871_v62 = vpop.f32.mrb[23].mxu1  ;;  %v1488_v63 = vadd.f32 %v1482_v53, %v1328_v33 }
0x13b4   :  { %v1494_v2 = vsel %vm88_vm1, %v1488_v63, 0.0  ;;  %v1489_v5 = vadd.f32 %v1485_v61, %v1329_v60 }
0x13b5   :  { %1495 = vadd.xlane.f32.xlu1 %v1494_v2 }
0x13b6   :  { %v1497_v6 = vsel %vm88_vm1, %v1489_v5, 0.0 }
0x13b7   :  { %1498 = vadd.xlane.f32.xlu0 %v1497_v6 }
0x1442   :  { %v1496_v7 = vpop.xlane.xlu1 %1495 }
0x1443   :  { %v1500_v30 = vmul.f32 0.03125, %v1496_v7 }
0x1444   :  { %v1499_v8 = vpop.xlane.xlu0 %1498 }
0x1445   :  { %v1502_v29 = vsub.f32 %v1488_v63, %v1500_v30  ;;  %v1501_v9 = vmul.f32 0.03125, %v1499_v8 }
0x1447   :  { %v1503_v10 = vsub.f32 %v1489_v5, %v1501_v9  ;;  %v1504_v11 = vmul.f32 %v1502_v29, %v1502_v29 }
0x1449   :  { %v1506_v12 = vsel %vm88_vm1, %v1504_v11, 0.0  ;;  %v1505_v3 = vmul.f32 %v1503_v10, %v1503_v10 }
0x144a   :  { %1507 = vadd.xlane.f32.xlu1 %v1506_v12 }
0x144b   :  { %v1509_v4 = vsel %vm88_vm1, %v1505_v3, 0.0 }
0x144c   :  { %1510 = vadd.xlane.f32.xlu0 %v1509_v4 }
0x14d7   :  { %v1508_v13 = vpop.xlane.xlu1 %1507 }
0x14d8   :  { %v1512_v14 = vmul.f32 0.03125, %v1508_v13 }
0x14d9   :  { %v1511_v15 = vpop.xlane.xlu0 %1510 }
0x14da   :  { %v1514_v17 = vadd.f32 1e-05, %v1512_v14  ;;  %v1513_v18 = vmul.f32 0.03125, %v1511_v15 }
0x14dc   :  { %2016 = vrsqrt.f32 %v1514_v17  ;;  %v1515_v19 = vadd.f32 1e-05, %v1513_v18 }
0x14de   :  { %2018 = vrsqrt.f32 %v1515_v19 }
0x14e6   :  { %v2017_v37 = vpop.eup %2016 }
0x14e7   :  { %v1518_v54 = vmul.f32 %v2017_v37, %v1502_v29 }
0x14e8   :  { %v2019_v27 = vpop.eup %2018 }
0x14e9   :  { %v1526_v21 = vmul.f32 %v1672_v20, %v1518_v54  ;;  %v1519_v1 = vmul.f32 %v2019_v27, %v1503_v10 }
0x14eb   :  { %v1534_v44 = vadd.f32 %v1673_v28, %v1526_v21  ;;  %v1527_v41 = vmul.f32 %v1672_v20, %v1519_v1 }
0x14ed   :  { %v1538_v56 = vsel %vm88_vm1, %v1534_v44, 0.0  ;;  %v1535_v22 = vadd.f32 %v1673_v28, %v1527_v41 }
0x14ee   :  { %1539 = vadd.xlane.f32.xlu1 %v1538_v56 }
0x14ef   :  { %v1541_v23 = vsel %vm88_vm1, %v1535_v22, 0.0 }
0x14f0   :  { %1542 = vadd.xlane.f32.xlu0 %v1541_v23 }
0x157b   :  { %v1540_v40 = vpop.xlane.xlu1 %1539 }
0x157c   :  { %v1544_v16 = vmul.f32 0.03125, %v1540_v40 }
0x157d   :  { %v1543_v24 = vpop.xlane.xlu0 %1542 }
0x157e   :  { %v1546_v51 = vsub.f32 %v1534_v44, %v1544_v16  ;;  %v1545_v55 = vmul.f32 0.03125, %v1543_v24 }
0x1580   :  { %v1547_v59 = vsub.f32 %v1535_v22, %v1545_v55  ;;  %v1548_v25 = vmul.f32 %v1546_v51, %v1546_v51 }
0x1582   :  { %v1550_v26 = vsel %vm88_vm1, %v1548_v25, 0.0  ;;  %v1549_v31 = vmul.f32 %v1547_v59, %v1547_v59 }
0x1583   :  { %1551 = vadd.xlane.f32.xlu1 %v1550_v26 }
0x1584   :  { %v1553_v32 = vsel %vm88_vm1, %v1549_v31, 0.0 }
0x1585   :  { %1554 = vadd.xlane.f32.xlu0 %v1553_v32 }
0x1610   :  { %v1552_v33 = vpop.xlane.xlu1 %1551 }
0x1611   :  { %v1556_v60 = vmul.f32 0.03125, %v1552_v33 }
0x1612   :  { %v1555_v34 = vpop.xlane.xlu0 %1554 }
0x1613   :  { %v1558_v35 = vadd.f32 1e-05, %v1556_v60  ;;  %v1557_v36 = vmul.f32 0.03125, %v1555_v34 }
0x1615   :  { %2020 = vrsqrt.f32 %v1558_v35  ;;  %v1559_v38 = vadd.f32 1e-05, %v1557_v36 }
0x1617   :  { %2022 = vrsqrt.f32 %v1559_v38 }
0x161f   :  { %v2021_v39 = vpop.eup %2020 }
0x1620   :  { %v1562_v43 = vmul.f32 %v2021_v39, %v1546_v51 }
0x1621   :  { %v2023_v45 = vpop.eup %2022 }
0x1622   :  { %v1570_v46 = vmul.f32 %v1674_v42, %v1562_v43  ;;  %v1563_v48 = vmul.f32 %v2023_v45, %v1547_v59 }
0x1624   :  { %v1578_v49 = vadd.f32 %v1675_v47, %v1570_v46  ;;  %v1571_v50 = vmul.f32 %v1674_v42, %v1563_v48 }
0x1626   :  { %1580 = vst.msk [vmem:[%s2569_s16] sm:$0xff] %vm88_vm1, %v1578_v49  ;;  %v1579_v0 = vadd.f32 %v1675_v47, %v1571_v50 }
0x1628   :  { %1581 = vst.msk [vmem:[%s2569_s16 + $0x8] sm:$0xff] %vm88_vm1, %v1579_v0 }

</bundles_post_ra>
